<compile_context>
chip_gen: v6e
topology: v6e:2x2x1
jax: 0.10.0
libtpu: 0.0.40
codegen_flags: <defaults>
</compile_context>

<pallas_src>
import functools

import jax
import jax.numpy as jnp
from jax import lax
from jax.experimental import pallas as pl
from jax.experimental.pallas import tpu as pltpu

_LANE = 128
_SUBLANE_F32 = 8
_MAX_NODE_CHUNK = 8          # inner chunk size bounding live vregs (review item)


def _embedded_attention_kernel(emb_ref, val_ref, wqkT_ref, bqk_ref,
                               wvT_ref, bv_ref, out_ref, q_scr, k_scr,
                               *, node_chunk, approx_recip):
    """One grid step = one (node tile, batch element)."""
    TN, S, E = emb_ref.shape
    D = wvT_ref.shape[1]
    n_chunks = TN // node_chunk
    mm_dtype = wqkT_ref.dtype        # f32 (precise) or bf16 (fast), set by wrapper

    # ---- batch-invariant part: query / key depend only on the node embeddings.
    # Computed once per node tile (first batch step) and cached in VMEM scratch
    # for the remaining B-1 batch steps.
    # CORRECTNESS NOTE: this gate is tied to grid = (node_tiles, B) with the
    # batch axis innermost and "arbitrary"; reordering the grid axes or the
    # dimension_semantics would silently reuse stale scratch across node tiles.
    @pl.when(pl.program_id(1) == 0)
    def _():
        def qk_chunk(c, carry):
            off = pl.multiple_of(c * node_chunk, node_chunk)
            emb2 = emb_ref[pl.ds(off, node_chunk), :, :].reshape(node_chunk * S, E)
            qk = jnp.dot(emb2.astype(mm_dtype), wqkT_ref[...],
                         preferred_element_type=jnp.float32) + bqk_ref[...]
            qk = qk.reshape(node_chunk, S, D)           # f32 softmax math below

            # query = softmax over the model dim (last axis).
            qm = jnp.max(qk, axis=-1, keepdims=True)
            qe = jnp.exp(qk - qm)
            q = qe * pl.reciprocal(jnp.sum(qe, axis=-1, keepdims=True),
                                   approx=approx_recip)

            # key = softmax(qk^T, -1) kept UNtransposed: softmax over the seq
            # axis (mathematically identical; no (D, S) tile materialized).
            km = jnp.max(qk, axis=1, keepdims=True)
            ke = jnp.exp(qk - km)
            k = ke * pl.reciprocal(jnp.sum(ke, axis=1, keepdims=True),
                                   approx=approx_recip)

            q_scr[pl.ds(off, node_chunk), :, :] = q.astype(q_scr.dtype)
            k_scr[pl.ds(off, node_chunk), :, :] = k.astype(k_scr.dtype)
            return carry

        lax.fori_loop(0, n_chunks, qk_chunk, 0, unroll=True)

    # ---- per-batch part, chunked over nodes so the live intermediates
    # (v, kv, out) stay inside the 64-vreg file even for large DMA tiles.
    def out_chunk(c, carry):
        off = pl.multiple_of(c * node_chunk, node_chunk)
        val2 = val_ref[pl.ds(off, node_chunk), :, :].reshape(node_chunk * S, D)
        v = jnp.dot(val2.astype(mm_dtype), wvT_ref[...],
                    preferred_element_type=jnp.float32) + bv_ref[...]
        v = v.reshape(node_chunk, S, D)

        q = q_scr[pl.ds(off, node_chunk), :, :]
        k = k_scr[pl.ds(off, node_chunk), :, :]

        # kv[n] = key[n]^T @ v[n]  -> contract the seq axis, no transpose.
        kv = jnp.einsum('nsd,nse->nde', k, v.astype(mm_dtype),
                        preferred_element_type=jnp.float32)      # (chunk, D, D)
        # out[n] = query[n] @ kv[n]
        out = jnp.einsum('nsd,nde->nse', q, kv.astype(mm_dtype),
                         preferred_element_type=jnp.float32)     # (chunk, S, D)

        out_ref[pl.ds(off, node_chunk), :, :] = out.astype(out_ref.dtype)
        return carry

    lax.fori_loop(0, n_chunks, out_chunk, 0, unroll=True)


def _padded_block_bytes(shape, itemsize, sublane=_SUBLANE_F32):
    """VMEM footprint of a block after (sublane, 128)-lane tiling/padding."""
    if len(shape) < 2:
        n = shape[0] if shape else 1
        return (-(-n // _LANE) * _LANE) * itemsize
    *lead, s, l = shape
    n_lead = 1
    for d in lead:
        n_lead *= d
    return n_lead * (-(-s // sublane) * sublane) * (-(-l // _LANE) * _LANE) * itemsize


def _choose_tile_n(n_nodes, seq, model_dim, itemsize, target_bytes):
    """Largest node tile keeping the (layout-padded) value block near target."""
    per_node = _padded_block_bytes((seq, model_dim), itemsize)
    cap = max(1, target_bytes // per_node)
    if cap >= n_nodes:
        return n_nodes
    if cap >= _MAX_NODE_CHUNK:
        return (cap // _MAX_NODE_CHUNK) * _MAX_NODE_CHUNK
    return cap


def _choose_node_chunk(tile_n):
    for c in (_MAX_NODE_CHUNK, 4, 2, 1):
        if tile_n % c == 0:
            return c
    return 1


@functools.partial(jax.jit, static_argnames=("tile_n", "precise",
                                              "value_buffers",
                                              "target_block_bytes"))
def embedded_attention(value, emb, wqk, bqk, wv, bv, *, tile_n=None,
                       precise=False, value_buffers=None,
                       target_block_bytes=4 << 20):
    """Forward pass of ImputeFormer's EmbeddedAttention.

    precise=False -> bf16 MXU inputs + EUP approx reciprocal (f32 accumulation,
                     f32 softmax math).  precise=True -> all f32 + exact recip.
    value_buffers -> optional pipeline depth (e.g. 3 on v5e if the value/out
                     DMA is still exposed); None keeps the default double buffer.
    """
    B, N, S, D = value.shape
    Ne, Se, E = emb.shape
    assert (Ne, Se) == (N, S), "emb must be (N, S, E) matching value's (N, S)"
    # Layout-preserving in-kernel reshapes (TN, S, D) <-> (TN*S, D) need the
    # seq axis on a sublane boundary; padding S would corrupt the key softmax
    # (taken over the seq axis), so require alignment instead.
    assert S % _SUBLANE_F32 == 0, f"seq length S={S} must be a multiple of 8"

    if tile_n is None:
        tile_n = _choose_tile_n(N, S, D, value.dtype.itemsize, target_block_bytes)
    if tile_n <= 0:
        raise ValueError(f"tile_n must be positive, got {tile_n}")
    node_chunk = _choose_node_chunk(tile_n)

    # Pad the node axis instead of hunting for divisors: padded (zero) nodes are
    # independent of the real ones and their outputs are sliced off below.
    n_pad = (-N) % tile_n
    if n_pad:
        value = jnp.pad(value, ((0, 0), (0, n_pad), (0, 0), (0, 0)))
        emb = jnp.pad(emb, ((0, n_pad), (0, 0), (0, 0)))
    Np = N + n_pad

    mm_dtype = jnp.float32 if precise else jnp.bfloat16
    mm_isz = jnp.dtype(mm_dtype).itemsize
    scr_sublane = _SUBLANE_F32 if precise else 16

    # Wrapper-side layout plumbing (grid-invariant): transpose + cast the
    # weights once, so the kernel never spends XLU slots on .T or repeats casts.
    wqkT = jnp.transpose(wqk).astype(mm_dtype)      # (E, D)
    wvT = jnp.transpose(wv).astype(mm_dtype)        # (D, D)
    bqk2 = bqk.reshape(1, D).astype(jnp.float32)
    bv2 = bv.reshape(1, D).astype(jnp.float32)

    grid = (Np // tile_n, B)        # node tiles outer (parallel), batch inner

    # VMEM budget from the real (layout-padded) working set, with headroom.
    nbuf = 2 if value_buffers is None else value_buffers
    val_blk = tile_n * _padded_block_bytes((S, D), value.dtype.itemsize)
    emb_blk = tile_n * _padded_block_bytes((S, E), emb.dtype.itemsize)
    scr_blk = 2 * tile_n * _padded_block_bytes((S, D), mm_isz, sublane=scr_sublane)
    w_blk = 2 * (_padded_block_bytes((E, D), mm_isz, sublane=scr_sublane)
                 + _padded_block_bytes((D, D), mm_isz, sublane=scr_sublane)
                 + 2 * _padded_block_bytes((1, D), 4))
    need = nbuf * 2 * val_blk + 2 * emb_blk + scr_blk + w_blk
    # Cap at 48 MiB: safe on v7x (64 MiB physical), well under v5e/v6e (128 MiB).
    vmem_limit = min(max(int(1.5 * need) + (4 << 20), 32 << 20), 48 << 20)
    if need + (2 << 20) > vmem_limit:
        raise ValueError(
            f"tile_n={tile_n} needs ~{need >> 20} MiB of VMEM; lower tile_n or "
            "target_block_bytes (v7x has only 64 MiB physical VMEM).")

    kernel = functools.partial(_embedded_attention_kernel,
                               node_chunk=node_chunk,
                               approx_recip=not precise)

    def _streamed_spec():
        kwargs = {}
        if value_buffers is not None:
            kwargs["pipeline_mode"] = pl.Buffered(value_buffers)
        return pl.BlockSpec((None, tile_n, S, D), lambda n, b: (b, n, 0, 0),
                            **kwargs)

    out = pl.pallas_call(
        kernel,
        out_shape=jax.ShapeDtypeStruct((B, Np, S, D), value.dtype),
        grid_spec=pltpu.PrefetchScalarGridSpec(
            num_scalar_prefetch=0,
            grid=grid,
            in_specs=[
                # emb tile: block index constant across the inner batch axis,
                # so its re-DMA is skipped on revisits.
                pl.BlockSpec((tile_n, S, E), lambda n, b: (n, 0, 0)),
                _streamed_spec(),                               # value
                pl.BlockSpec((E, D), lambda n, b: (0, 0)),      # FC_Q_K weight^T
                pl.BlockSpec((1, D), lambda n, b: (0, 0)),      # FC_Q_K bias
                pl.BlockSpec((D, D), lambda n, b: (0, 0)),      # FC_V weight^T
                pl.BlockSpec((1, D), lambda n, b: (0, 0)),      # FC_V bias
            ],
            out_specs=_streamed_spec(),
            scratch_shapes=[
                pltpu.VMEM((tile_n, S, D), mm_dtype),   # cached query
                pltpu.VMEM((tile_n, S, D), mm_dtype),   # cached key (untransposed)
            ],
        ),
        compiler_params=pltpu.CompilerParams(
            # Node tiles shard across v7x's two TensorCores ("parallel"); the
            # batch axis carries the cached q/k scratch -> "arbitrary".
            dimension_semantics=("parallel", "arbitrary"),
            vmem_limit_bytes=vmem_limit),
    )(emb, value, wqkT, bqk2, wvT, bv2)

    return out[:, :N] if n_pad else out


def _reference(value, emb, wqk, bqk, wv, bv):
    # Pure-JAX mirror of the PyTorch forward for correctness checking.
    B = value.shape[0]
    qk = emb @ wqk.T + bqk                                   # (N, S, D)
    query = jax.nn.softmax(qk, axis=-1)                      # (N, S, D)
    key = jax.nn.softmax(jnp.swapaxes(qk, -1, -2), axis=-1)  # (N, D, S)
    v = value @ wv.T + bv                                    # (B, N, S, D)
    query = jnp.broadcast_to(query[None], (B,) + query.shape)
    key = jnp.broadcast_to(key[None], (B,) + key.shape)
    out = key @ v                                            # (B, N, D, D)
    out = query @ out                                        # (B, N, S, D)
    return out


def _init_linear(key, out_features, in_features):
    # Deterministic init mimicking torch.nn.Linear (uniform +/- 1/sqrt(fan_in)).
    kw, kb = jax.random.split(key)
    bound = 1.0 / jnp.sqrt(in_features)
    w = jax.random.uniform(kw, (out_features, in_features),
                           minval=-bound, maxval=bound, dtype=jnp.float32)
    b = jax.random.uniform(kb, (out_features,),
                           minval=-bound, maxval=bound, dtype=jnp.float32)
    return w, b


if __name__ == "__main__":
    # batch, nodes, seq, model_dim, node_embedding_dim
    B, N, S, D, E = 2, 16, 8, 32, 16

    root = jax.random.PRNGKey(0)
    k_val, k_emb, k_qk, k_v, k_out = jax.random.split(root, 5)

    value = jax.random.normal(k_val, (B, N, S, D), dtype=jnp.float32)
    emb = jax.random.normal(k_emb, (N, S, E), dtype=jnp.float32)

    wqk, bqk = _init_linear(k_qk, D, E)       # FC_Q_K: Linear(E -> D)
    wv, bv = _init_linear(k_v, D, D)          # FC_V:   Linear(D -> D)
    w_out, b_out = _init_linear(k_out, D, D)  # out_proj (unused in forward)

    with jax.default_matmul_precision("highest"):
        ref = _reference(value, emb, wqk, bqk, wv, bv)

    # Fast path (default): bf16 MXU inputs + approx reciprocal, auto tile_n
    # (= 16 here, exercising the 2-iteration inner node-chunk loop).
    out_fast = jax.block_until_ready(
        embedded_attention(value, emb, wqk, bqk, wv, bv))
    assert out_fast.shape == (B, N, S, D)
    assert jnp.allclose(out_fast, ref, atol=5e-2, rtol=5e-2), (
        float(jnp.max(jnp.abs(out_fast - ref))))

    # Precise path: f32 matmul inputs + exact reciprocal; tile_n=8 gives 2
    # "parallel" node tiles so both v7x TensorCores get work (single-TC v5e/v6e
    # would prefer the auto tile).  Tolerance is 5e-3 rather than 1e-5 because
    # f32 MXU matmuls (kernel and/or XLA reference) may be decomposed into bf16
    # passes; real bugs produce O(1) errors, so this still catches them while
    # being far tighter than the fast-path check.
    out_precise = jax.block_until_ready(
        embedded_attention(value, emb, wqk, bqk, wv, bv, tile_n=8, precise=True))
    assert out_precise.shape == (B, N, S, D)
    assert jnp.allclose(out_precise, ref, atol=5e-3, rtol=5e-3), (
        float(jnp.max(jnp.abs(out_precise - ref))))

    print("KERNEL_OK")
</pallas_src>

<mosaic_0001>
module attributes {stable_mosaic.version = 11 : i64} {
  func.func @_embedded_attention_kernel(%arg0: i32, %arg1: i32, %arg2: memref<16x8x16xf32, #tpu.memory_space<vmem>>, %arg3: memref<1x16x8x32xf32, #tpu.memory_space<vmem>>, %arg4: memref<16x32xbf16, #tpu.memory_space<vmem>>, %arg5: memref<1x32xf32, #tpu.memory_space<vmem>>, %arg6: memref<32x32xbf16, #tpu.memory_space<vmem>>, %arg7: memref<1x32xf32, #tpu.memory_space<vmem>>, %arg8: memref<1x16x8x32xf32, #tpu.memory_space<vmem>>, %arg9: memref<16x8x32xbf16, #tpu.memory_space<vmem>>, %arg10: memref<16x8x32xbf16, #tpu.memory_space<vmem>>) attributes {dimension_semantics = [#tpu.dimension_semantics<parallel>, #tpu.dimension_semantics<arbitrary>], iteration_bounds = array<i64: 1, 2>, scalar_prefetch = 0 : i64, scratch_operands = 2 : i64, tpu.core_type = #tpu.core_type<tc>, window_params = [{transform_indices = @transform_0, window_bounds = array<i64: 16, 8, 16>}, {transform_indices = @transform_1, window_bounds = array<i64: 1, 16, 8, 32>}, {pipeline_mode = #tpu.pipeline_mode<synchronous>, transform_indices = @transform_2, window_bounds = array<i64: 16, 32>}, {pipeline_mode = #tpu.pipeline_mode<synchronous>, transform_indices = @transform_3, window_bounds = array<i64: 1, 32>}, {pipeline_mode = #tpu.pipeline_mode<synchronous>, transform_indices = @transform_4, window_bounds = array<i64: 32, 32>}, {pipeline_mode = #tpu.pipeline_mode<synchronous>, transform_indices = @transform_5, window_bounds = array<i64: 1, 32>}, {transform_indices = @transform_6, window_bounds = array<i64: 1, 16, 8, 32>}]} {
    %c0_i32 = arith.constant 0 : i32
    %0 = arith.cmpi eq, %arg1, %c0_i32 : i32
    %1 = arith.extui %0 : i1 to i32
    %c0_i32_0 = arith.constant 0 : i32
    %2 = arith.cmpi ne, %1, %c0_i32_0 : i32
    scf.if %2 {
      %c0_i32_35 = arith.constant 0 : i32
      %c8_i32_36 = arith.constant 8 : i32
      %53 = arith.muli %c0_i32_35, %c8_i32_36 : i32
      %54 = tpu.assume_multiple %53, 8 : i32
      %55 = arith.index_cast %54 : i32 to index
      %c0_37 = arith.constant 0 : index
      %c0_38 = arith.constant 0 : index
      %56 = vector.load %arg2[%55, %c0_37, %c0_38] : memref<16x8x16xf32, #tpu.memory_space<vmem>>, vector<8x8x16xf32>
      %57 = vector.shape_cast %56 : vector<8x8x16xf32> to vector<64x16xf32>
      %58 = arith.truncf %57 : vector<64x16xf32> to vector<64x16xbf16>
      %c0_39 = arith.constant 0 : index
      %c0_40 = arith.constant 0 : index
      %59 = vector.load %arg4[%c0_39, %c0_40] : memref<16x32xbf16, #tpu.memory_space<vmem>>, vector<16x32xbf16>
      %cst_41 = arith.constant dense<0.000000e+00> : vector<64x32xf32>
      %60 = tpu.matmul %58, %59, %cst_41 {dimension_numbers = #tpu.dot_dimension_numbers<[1], [0], [0], [1], [0, 0, 1, 1], [], []>} : vector<64x16xbf16>, vector<16x32xbf16>, vector<64x32xf32> -> vector<64x32xf32>
      %c0_42 = arith.constant 0 : index
      %c0_43 = arith.constant 0 : index
      %61 = vector.load %arg5[%c0_42, %c0_43] : memref<1x32xf32, #tpu.memory_space<vmem>>, vector<1x32xf32>
      %62 = vector.broadcast %61 : vector<1x32xf32> to vector<64x32xf32>
      %63 = arith.addf %60, %62 : vector<64x32xf32>
      %64 = vector.shape_cast %63 : vector<64x32xf32> to vector<8x8x32xf32>
      %cst_44 = arith.constant dense<0xFF800000> : vector<8x8xf32>
      %65 = vector.multi_reduction <maximumf>, %64, %cst_44 [2] : vector<8x8x32xf32> to vector<8x8xf32>
      %66 = vector.shape_cast %65 : vector<8x8xf32> to vector<8x8x1xf32>
      %67 = vector.broadcast %66 : vector<8x8x1xf32> to vector<8x8x32xf32>
      %68 = arith.subf %64, %67 : vector<8x8x32xf32>
      %69 = math.exp %68 : vector<8x8x32xf32>
      %cst_45 = arith.constant dense<0.000000e+00> : vector<8x8xf32>
      %70 = vector.multi_reduction <add>, %69, %cst_45 [2] : vector<8x8x32xf32> to vector<8x8xf32>
      %71 = vector.shape_cast %70 : vector<8x8xf32> to vector<8x8x1xf32>
      %72 = tpu.reciprocal %71 {approx = true} : vector<8x8x1xf32> -> vector<8x8x1xf32>
      %73 = vector.broadcast %72 : vector<8x8x1xf32> to vector<8x8x32xf32>
      %74 = arith.mulf %69, %73 : vector<8x8x32xf32>
      %cst_46 = arith.constant dense<0xFF800000> : vector<8x32xf32>
      %75 = vector.multi_reduction <maximumf>, %64, %cst_46 [1] : vector<8x8x32xf32> to vector<8x32xf32>
      %76 = vector.shape_cast %75 : vector<8x32xf32> to vector<8x1x32xf32>
      %77 = vector.broadcast %76 : vector<8x1x32xf32> to vector<8x8x32xf32>
      %78 = arith.subf %64, %77 : vector<8x8x32xf32>
      %79 = math.exp %78 : vector<8x8x32xf32>
      %cst_47 = arith.constant dense<0.000000e+00> : vector<8x32xf32>
      %80 = vector.multi_reduction <add>, %79, %cst_47 [1] : vector<8x8x32xf32> to vector<8x32xf32>
      %81 = vector.shape_cast %80 : vector<8x32xf32> to vector<8x1x32xf32>
      %82 = tpu.reciprocal %81 {approx = true} : vector<8x1x32xf32> -> vector<8x1x32xf32>
      %83 = vector.broadcast %82 : vector<8x1x32xf32> to vector<8x8x32xf32>
      %84 = arith.mulf %79, %83 : vector<8x8x32xf32>
      %85 = arith.truncf %74 : vector<8x8x32xf32> to vector<8x8x32xbf16>
      %86 = arith.index_cast %54 : i32 to index
      %c0_48 = arith.constant 0 : index
      %c0_49 = arith.constant 0 : index
      %87 = vector.load %arg9[%86, %c0_48, %c0_49] : memref<16x8x32xbf16, #tpu.memory_space<vmem>>, vector<8x8x32xbf16>
      tpu.vector_store %arg9[%86, %c0_48, %c0_49], %85 {strides = array<i32>} : memref<16x8x32xbf16, #tpu.memory_space<vmem>>, vector<8x8x32xbf16>,
      %88 = arith.truncf %84 : vector<8x8x32xf32> to vector<8x8x32xbf16>
      %89 = arith.index_cast %54 : i32 to index
      %c0_50 = arith.constant 0 : index
      %c0_51 = arith.constant 0 : index
      %90 = vector.load %arg10[%89, %c0_50, %c0_51] : memref<16x8x32xbf16, #tpu.memory_space<vmem>>, vector<8x8x32xbf16>
      tpu.vector_store %arg10[%89, %c0_50, %c0_51], %88 {strides = array<i32>} : memref<16x8x32xbf16, #tpu.memory_space<vmem>>, vector<8x8x32xbf16>,
      %c1_i32_52 = arith.constant 1 : i32
      %c8_i32_53 = arith.constant 8 : i32
      %91 = arith.muli %c1_i32_52, %c8_i32_53 : i32
      %92 = tpu.assume_multiple %91, 8 : i32
      %93 = arith.index_cast %92 : i32 to index
      %c0_54 = arith.constant 0 : index
      %c0_55 = arith.constant 0 : index
      %94 = vector.load %arg2[%93, %c0_54, %c0_55] : memref<16x8x16xf32, #tpu.memory_space<vmem>>, vector<8x8x16xf32>
      %95 = vector.shape_cast %94 : vector<8x8x16xf32> to vector<64x16xf32>
      %96 = arith.truncf %95 : vector<64x16xf32> to vector<64x16xbf16>
      %c0_56 = arith.constant 0 : index
      %c0_57 = arith.constant 0 : index
      %97 = vector.load %arg4[%c0_56, %c0_57] : memref<16x32xbf16, #tpu.memory_space<vmem>>, vector<16x32xbf16>
      %cst_58 = arith.constant dense<0.000000e+00> : vector<64x32xf32>
      %98 = tpu.matmul %96, %97, %cst_58 {dimension_numbers = #tpu.dot_dimension_numbers<[1], [0], [0], [1], [0, 0, 1, 1], [], []>} : vector<64x16xbf16>, vector<16x32xbf16>, vector<64x32xf32> -> vector<64x32xf32>
      %c0_59 = arith.constant 0 : index
      %c0_60 = arith.constant 0 : index
      %99 = vector.load %arg5[%c0_59, %c0_60] : memref<1x32xf32, #tpu.memory_space<vmem>>, vector<1x32xf32>
      %100 = vector.broadcast %99 : vector<1x32xf32> to vector<64x32xf32>
      %101 = arith.addf %98, %100 : vector<64x32xf32>
      %102 = vector.shape_cast %101 : vector<64x32xf32> to vector<8x8x32xf32>
      %cst_61 = arith.constant dense<0xFF800000> : vector<8x8xf32>
      %103 = vector.multi_reduction <maximumf>, %102, %cst_61 [2] : vector<8x8x32xf32> to vector<8x8xf32>
      %104 = vector.shape_cast %103 : vector<8x8xf32> to vector<8x8x1xf32>
      %105 = vector.broadcast %104 : vector<8x8x1xf32> to vector<8x8x32xf32>
      %106 = arith.subf %102, %105 : vector<8x8x32xf32>
      %107 = math.exp %106 : vector<8x8x32xf32>
      %cst_62 = arith.constant dense<0.000000e+00> : vector<8x8xf32>
      %108 = vector.multi_reduction <add>, %107, %cst_62 [2] : vector<8x8x32xf32> to vector<8x8xf32>
      %109 = vector.shape_cast %108 : vector<8x8xf32> to vector<8x8x1xf32>
      %110 = tpu.reciprocal %109 {approx = true} : vector<8x8x1xf32> -> vector<8x8x1xf32>
      %111 = vector.broadcast %110 : vector<8x8x1xf32> to vector<8x8x32xf32>
      %112 = arith.mulf %107, %111 : vector<8x8x32xf32>
      %cst_63 = arith.constant dense<0xFF800000> : vector<8x32xf32>
      %113 = vector.multi_reduction <maximumf>, %102, %cst_63 [1] : vector<8x8x32xf32> to vector<8x32xf32>
      %114 = vector.shape_cast %113 : vector<8x32xf32> to vector<8x1x32xf32>
      %115 = vector.broadcast %114 : vector<8x1x32xf32> to vector<8x8x32xf32>
      %116 = arith.subf %102, %115 : vector<8x8x32xf32>
      %117 = math.exp %116 : vector<8x8x32xf32>
      %cst_64 = arith.constant dense<0.000000e+00> : vector<8x32xf32>
      %118 = vector.multi_reduction <add>, %117, %cst_64 [1] : vector<8x8x32xf32> to vector<8x32xf32>
      %119 = vector.shape_cast %118 : vector<8x32xf32> to vector<8x1x32xf32>
      %120 = tpu.reciprocal %119 {approx = true} : vector<8x1x32xf32> -> vector<8x1x32xf32>
      %121 = vector.broadcast %120 : vector<8x1x32xf32> to vector<8x8x32xf32>
      %122 = arith.mulf %117, %121 : vector<8x8x32xf32>
      %123 = arith.truncf %112 : vector<8x8x32xf32> to vector<8x8x32xbf16>
      %124 = arith.index_cast %92 : i32 to index
      %c0_65 = arith.constant 0 : index
      %c0_66 = arith.constant 0 : index
      %125 = vector.load %arg9[%124, %c0_65, %c0_66] : memref<16x8x32xbf16, #tpu.memory_space<vmem>>, vector<8x8x32xbf16>
      tpu.vector_store %arg9[%124, %c0_65, %c0_66], %123 {strides = array<i32>} : memref<16x8x32xbf16, #tpu.memory_space<vmem>>, vector<8x8x32xbf16>,
      %126 = arith.truncf %122 : vector<8x8x32xf32> to vector<8x8x32xbf16>
      %127 = arith.index_cast %92 : i32 to index
      %c0_67 = arith.constant 0 : index
      %c0_68 = arith.constant 0 : index
      %128 = vector.load %arg10[%127, %c0_67, %c0_68] : memref<16x8x32xbf16, #tpu.memory_space<vmem>>, vector<8x8x32xbf16>
      tpu.vector_store %arg10[%127, %c0_67, %c0_68], %126 {strides = array<i32>} : memref<16x8x32xbf16, #tpu.memory_space<vmem>>, vector<8x8x32xbf16>,
      %c2_i32_69 = arith.constant 2 : i32
    } else {
    }
    %c0_i32_1 = arith.constant 0 : i32
    %c8_i32 = arith.constant 8 : i32
    %3 = arith.muli %c0_i32_1, %c8_i32 : i32
    %4 = tpu.assume_multiple %3, 8 : i32
    %c0 = arith.constant 0 : index
    %5 = arith.index_cast %4 : i32 to index
    %c0_2 = arith.constant 0 : index
    %c0_3 = arith.constant 0 : index
    %6 = vector.load %arg3[%c0, %5, %c0_2, %c0_3] : memref<1x16x8x32xf32, #tpu.memory_space<vmem>>, vector<1x8x8x32xf32>
    %7 = vector.shape_cast %6 : vector<1x8x8x32xf32> to vector<8x8x32xf32>
    %8 = vector.shape_cast %7 : vector<8x8x32xf32> to vector<64x32xf32>
    %9 = arith.truncf %8 : vector<64x32xf32> to vector<64x32xbf16>
    %c0_4 = arith.constant 0 : index
    %c0_5 = arith.constant 0 : index
    %10 = vector.load %arg6[%c0_4, %c0_5] : memref<32x32xbf16, #tpu.memory_space<vmem>>, vector<32x32xbf16>
    %cst = arith.constant dense<0.000000e+00> : vector<64x32xf32>
    %11 = tpu.matmul %9, %10, %cst {dimension_numbers = #tpu.dot_dimension_numbers<[1], [0], [0], [1], [0, 0, 1, 1], [], []>} : vector<64x32xbf16>, vector<32x32xbf16>, vector<64x32xf32> -> vector<64x32xf32>
    %c0_6 = arith.constant 0 : index
    %c0_7 = arith.constant 0 : index
    %12 = vector.load %arg7[%c0_6, %c0_7] : memref<1x32xf32, #tpu.memory_space<vmem>>, vector<1x32xf32>
    %13 = vector.broadcast %12 : vector<1x32xf32> to vector<64x32xf32>
    %14 = arith.addf %11, %13 : vector<64x32xf32>
    %15 = vector.shape_cast %14 : vector<64x32xf32> to vector<8x8x32xf32>
    %16 = arith.index_cast %4 : i32 to index
    %c0_8 = arith.constant 0 : index
    %c0_9 = arith.constant 0 : index
    %17 = vector.load %arg9[%16, %c0_8, %c0_9] : memref<16x8x32xbf16, #tpu.memory_space<vmem>>, vector<8x8x32xbf16>
    %18 = arith.index_cast %4 : i32 to index
    %c0_10 = arith.constant 0 : index
    %c0_11 = arith.constant 0 : index
    %19 = vector.load %arg10[%18, %c0_10, %c0_11] : memref<16x8x32xbf16, #tpu.memory_space<vmem>>, vector<8x8x32xbf16>
    %20 = arith.truncf %15 : vector<8x8x32xf32> to vector<8x8x32xbf16>
    "tpu.trace_start"() <{level = 10 : i32, message = "nsd,nse->nde"}> : () -> ()
    %cst_12 = arith.constant dense<0.000000e+00> : vector<8x32x32xf32>
    %21 = tpu.matmul %19, %20, %cst_12 {dimension_numbers = #tpu.dot_dimension_numbers<[1], [1], [2], [2], [0, 0, 0, 2, 1, 2], [0], [0]>} : vector<8x8x32xbf16>, vector<8x8x32xbf16>, vector<8x32x32xf32> -> vector<8x32x32xf32>
    "tpu.trace_stop"() : () -> ()
    %22 = arith.truncf %21 : vector<8x32x32xf32> to vector<8x32x32xbf16>
    "tpu.trace_start"() <{level = 10 : i32, message = "nsd,nde->nse"}> : () -> ()
    %cst_13 = arith.constant dense<0.000000e+00> : vector<8x8x32xf32>
    %23 = tpu.matmul %17, %22, %cst_13 {dimension_numbers = #tpu.dot_dimension_numbers<[2], [1], [1], [2], [0, 0, 0, 1, 1, 2], [0], [0]>} : vector<8x8x32xbf16>, vector<8x32x32xbf16>, vector<8x8x32xf32> -> vector<8x8x32xf32>
    "tpu.trace_stop"() : () -> ()
    %c0_14 = arith.constant 0 : index
    %24 = arith.index_cast %4 : i32 to index
    %c0_15 = arith.constant 0 : index
    %c0_16 = arith.constant 0 : index
    %25 = vector.load %arg8[%c0_14, %24, %c0_15, %c0_16] : memref<1x16x8x32xf32, #tpu.memory_space<vmem>>, vector<1x8x8x32xf32>
    %26 = vector.shape_cast %25 : vector<1x8x8x32xf32> to vector<8x8x32xf32>
    %27 = vector.shape_cast %23 : vector<8x8x32xf32> to vector<1x8x8x32xf32>
    tpu.vector_store %arg8[%c0_14, %24, %c0_15, %c0_16], %27 {strides = array<i32>} : memref<1x16x8x32xf32, #tpu.memory_space<vmem>>, vector<1x8x8x32xf32>,
    %c1_i32 = arith.constant 1 : i32
    %c8_i32_17 = arith.constant 8 : i32
    %28 = arith.muli %c1_i32, %c8_i32_17 : i32
    %29 = tpu.assume_multiple %28, 8 : i32
    %c0_18 = arith.constant 0 : index
    %30 = arith.index_cast %29 : i32 to index
    %c0_19 = arith.constant 0 : index
    %c0_20 = arith.constant 0 : index
    %31 = vector.load %arg3[%c0_18, %30, %c0_19, %c0_20] : memref<1x16x8x32xf32, #tpu.memory_space<vmem>>, vector<1x8x8x32xf32>
    %32 = vector.shape_cast %31 : vector<1x8x8x32xf32> to vector<8x8x32xf32>
    %33 = vector.shape_cast %32 : vector<8x8x32xf32> to vector<64x32xf32>
    %34 = arith.truncf %33 : vector<64x32xf32> to vector<64x32xbf16>
    %c0_21 = arith.constant 0 : index
    %c0_22 = arith.constant 0 : index
    %35 = vector.load %arg6[%c0_21, %c0_22] : memref<32x32xbf16, #tpu.memory_space<vmem>>, vector<32x32xbf16>
    %cst_23 = arith.constant dense<0.000000e+00> : vector<64x32xf32>
    %36 = tpu.matmul %34, %35, %cst_23 {dimension_numbers = #tpu.dot_dimension_numbers<[1], [0], [0], [1], [0, 0, 1, 1], [], []>} : vector<64x32xbf16>, vector<32x32xbf16>, vector<64x32xf32> -> vector<64x32xf32>
    %c0_24 = arith.constant 0 : index
    %c0_25 = arith.constant 0 : index
    %37 = vector.load %arg7[%c0_24, %c0_25] : memref<1x32xf32, #tpu.memory_space<vmem>>, vector<1x32xf32>
    %38 = vector.broadcast %37 : vector<1x32xf32> to vector<64x32xf32>
    %39 = arith.addf %36, %38 : vector<64x32xf32>
    %40 = vector.shape_cast %39 : vector<64x32xf32> to vector<8x8x32xf32>
    %41 = arith.index_cast %29 : i32 to index
    %c0_26 = arith.constant 0 : index
    %c0_27 = arith.constant 0 : index
    %42 = vector.load %arg9[%41, %c0_26, %c0_27] : memref<16x8x32xbf16, #tpu.memory_space<vmem>>, vector<8x8x32xbf16>
    %43 = arith.index_cast %29 : i32 to index
    %c0_28 = arith.constant 0 : index
    %c0_29 = arith.constant 0 : index
    %44 = vector.load %arg10[%43, %c0_28, %c0_29] : memref<16x8x32xbf16, #tpu.memory_space<vmem>>, vector<8x8x32xbf16>
    %45 = arith.truncf %40 : vector<8x8x32xf32> to vector<8x8x32xbf16>
    "tpu.trace_start"() <{level = 10 : i32, message = "nsd,nse->nde"}> : () -> ()
    %cst_30 = arith.constant dense<0.000000e+00> : vector<8x32x32xf32>
    %46 = tpu.matmul %44, %45, %cst_30 {dimension_numbers = #tpu.dot_dimension_numbers<[1], [1], [2], [2], [0, 0, 0, 2, 1, 2], [0], [0]>} : vector<8x8x32xbf16>, vector<8x8x32xbf16>, vector<8x32x32xf32> -> vector<8x32x32xf32>
    "tpu.trace_stop"() : () -> ()
    %47 = arith.truncf %46 : vector<8x32x32xf32> to vector<8x32x32xbf16>
    "tpu.trace_start"() <{level = 10 : i32, message = "nsd,nde->nse"}> : () -> ()
    %cst_31 = arith.constant dense<0.000000e+00> : vector<8x8x32xf32>
    %48 = tpu.matmul %42, %47, %cst_31 {dimension_numbers = #tpu.dot_dimension_numbers<[2], [1], [1], [2], [0, 0, 0, 1, 1, 2], [0], [0]>} : vector<8x8x32xbf16>, vector<8x32x32xbf16>, vector<8x8x32xf32> -> vector<8x8x32xf32>
    "tpu.trace_stop"() : () -> ()
    %c0_32 = arith.constant 0 : index
    %49 = arith.index_cast %29 : i32 to index
    %c0_33 = arith.constant 0 : index
    %c0_34 = arith.constant 0 : index
    %50 = vector.load %arg8[%c0_32, %49, %c0_33, %c0_34] : memref<1x16x8x32xf32, #tpu.memory_space<vmem>>, vector<1x8x8x32xf32>
    %51 = vector.shape_cast %50 : vector<1x8x8x32xf32> to vector<8x8x32xf32>
    %52 = vector.shape_cast %48 : vector<8x8x32xf32> to vector<1x8x8x32xf32>
    tpu.vector_store %arg8[%c0_32, %49, %c0_33, %c0_34], %52 {strides = array<i32>} : memref<1x16x8x32xf32, #tpu.memory_space<vmem>>, vector<1x8x8x32xf32>,
    %c2_i32 = arith.constant 2 : i32
    return
  }
  func.func @transform_0(%arg0: i32, %arg1: i32) -> (i32, i32, i32) {
    %c0_i32 = arith.constant 0 : i32
    %c0_i32_0 = arith.constant 0 : i32
    %c0_i32_1 = arith.constant 0 : i32
    return %arg0, %c0_i32, %c0_i32_0 : i32, i32, i32
  }
  func.func @transform_1(%arg0: i32, %arg1: i32) -> (i32, i32, i32, i32) {
    %c0_i32 = arith.constant 0 : i32
    %c0_i32_0 = arith.constant 0 : i32
    %c0_i32_1 = arith.constant 0 : i32
    return %arg1, %arg0, %c0_i32, %c0_i32_0 : i32, i32, i32, i32
  }
  func.func @transform_2(%arg0: i32, %arg1: i32) -> (i32, i32) {
    %c0_i32 = arith.constant 0 : i32
    %c0_i32_0 = arith.constant 0 : i32
    %c0_i32_1 = arith.constant 0 : i32
    return %c0_i32, %c0_i32_0 : i32, i32
  }
  func.func @transform_3(%arg0: i32, %arg1: i32) -> (i32, i32) {
    %c0_i32 = arith.constant 0 : i32
    %c0_i32_0 = arith.constant 0 : i32
    %c0_i32_1 = arith.constant 0 : i32
    return %c0_i32, %c0_i32_0 : i32, i32
  }
  func.func @transform_4(%arg0: i32, %arg1: i32) -> (i32, i32) {
    %c0_i32 = arith.constant 0 : i32
    %c0_i32_0 = arith.constant 0 : i32
    %c0_i32_1 = arith.constant 0 : i32
    return %c0_i32, %c0_i32_0 : i32, i32
  }
  func.func @transform_5(%arg0: i32, %arg1: i32) -> (i32, i32) {
    %c0_i32 = arith.constant 0 : i32
    %c0_i32_0 = arith.constant 0 : i32
    %c0_i32_1 = arith.constant 0 : i32
    return %c0_i32, %c0_i32_0 : i32, i32
  }
  func.func @transform_6(%arg0: i32, %arg1: i32) -> (i32, i32, i32, i32) {
    %c0_i32 = arith.constant 0 : i32
    %c0_i32_0 = arith.constant 0 : i32
    %c0_i32_1 = arith.constant 0 : i32
    return %arg1, %arg0, %c0_i32, %c0_i32_0 : i32, i32, i32, i32
  }
}

</mosaic_0001>

<bundles_post_ra>
// kernel: embedded_attention.1
= control target key start
LH: loop header
LB: loop body
LE: loop exit
PB: predicated region body
PF: predicated region fallthrough
CT: control target
= control target key end

     0   :  { %s5065_s0 = inlined_call_operand.hbm [shape: f32[16,8,16], index: 0, kind: input, shape index: {}]   ;;  %s5066_s1 = inlined_call_operand.hbm [shape: f32[2,16,8,32], index: 1, kind: input, shape index: {}]   ;;  %s5067_s2 = inlined_call_operand.vmem [shape: bf16[16,32], index: 2, kind: input, shape index: {}]   ;;  %s5068_s3 = inlined_call_operand.vmem [shape: f32[1,32], index: 3, kind: input, shape index: {}]   ;;  %s5069_s4 = inlined_call_operand.vmem [shape: bf16[32,32], index: 4, kind: input, shape index: {}]   ;;  %s5070_s5 = inlined_call_operand.vmem [shape: f32[1,32], index: 5, kind: input, shape index: {}]   ;;  %s5071_s6 = inlined_call_operand.hbm [shape: f32[2,16,8,32], index: 6, kind: output, shape index: {}]  }
   0x1   :  { %5077 = sst [smem:[#allocation15_spill]] %s5065_s0 }
   0x2   :  { %11 = vsyncpa [#allocation5], 0 }
   0x3   :  { %12 = vsyncpa [#allocation8], 0 }
   0x4   :  { %14 = vsyncpa [#allocation8 + $0x1], 0 }
   0x5   :  { %15 = vsyncpa [#allocation6], 0 }
   0x6   :  { %17 = vsyncpa [#allocation6 + $0x1], 0  ;;  %s4297_s21 = smov 0   ;;  %s4299_s22 = smov 0  }
   0x7   :  { %s4301_s23 = smov 0   ;;  %s4303_s24 = smov 0  }
   0x8   :  { %s4305_s25 = smov 0   ;;  %s4307_s26 = smov 0  }
   0x9 LB: > { %5078 = sst [smem:[#allocation13_spill]] %s4247_s25  ;;  %s3387_s27 = sadd.s32 4294967295, %s4251_s26   ;;  %s4251_s26 = sphi %s4307_s26, %s23_s26   ;;  %s4247_s25 = sphi %s4305_s25, %s5096_s25   ;;  %s4243_s24 = sphi %s4303_s24, %s5095_s24   ;;  %s4239_s23 = sphi %s4301_s23, %s5099_s23   ;;  %s4235_s22 = sphi %s4299_s22, %s5098_s22   ;;  %s4231_s21 = sphi %s4297_s21, %s5097_s21  }
   0xa   : > { %s3388_s28 = sadd.s32 4294967294, %s4251_s26   ;;  %p83_p0 = scmp.ne.s32.totalorder %s4235_s22, %s4231_s21 }
   0xb   : > { %p4331_p1 = scmp.eq.s32.totalorder %s3387_s27, 0  ;;  %p4335_p2 = scmp.eq.s32.totalorder %s3387_s27, 1 }
   0xc   : > { %p199_p3 = scmp.eq.s32.totalorder %s3388_s28, 1  ;;  %p3389_p5 = scmp.ge.s32.totalorder %s4251_s26, 1 }
   0xd   : > { %p4341_p4 = por %p4331_p1, %p83_p0  ;;  %p206_p7 = scmp.lt.s32.totalorder %s4251_s26, 3 }
   0xe   : > { %p4346_p6 = por %p199_p3, %p83_p0  ;;  %s4253_s10 = smov [#allocation4]  }
   0xf   : > { %s5081_s7 = scalar_select %p4341_p4, 1, 0 }
  0x10   : > { %s5082_s8 = scalar_select %p4346_p6, 1, 0 }
  0x11   : > { %p4351_p8 = pnand %p3389_p5, %p206_p7  ;;  %s221_s11 = sshll.u32 %s4253_s10, 4  ;;  %s222_s11 = int_to_ptr.vmem [resolvable:$true] %s221_s11 }
  0x12   : > { %s32_s13 = sadd.s32 1, %s4247_s25  ;;  %s4124_s14 = scalar_lea.vmem %s222_s11, 2048 }
  0x13   : > { %p3907_p9 = pneg %p4351_p8  ;;  %p4125_p13 = scmp.ne.s32.totalorder %s222_s11, %s4124_s14 }
  0x14   : > { %p4132_p5 = scmp.lt.s32.totalorder %s222_s11, %s222_s11  ;;  %p4133_p7 = scmp.lt.s32.totalorder %s4124_s14, %s4124_s14 }
  0x15   : > { %p4360_p11 = pnand %p3907_p9, %p4331_p1 }
  0x16   : > { %p4134_p6 = por %p4133_p7, %p4132_p5 }
  0x17   : > { %p4115_p12 = pneg %p4360_p11 }
  0x19   : > { %p4127_p0 = pnand %p4125_p13, %p4115_p12 }
  0x1b   : > { %p4128_p3 = pneg %p4127_p0 }
  0x1d   : > { %p4135_p4 = pnand %p4134_p6, %p4128_p3 }
  0x1f   : > { %4138 = shalt.err (!%p4135_p4)
}
  0x20   : > { %s5073_s15 = smov 128   ;;  %s5074_s16 = smov 8  }
  0x21   : > { %s5085_s0 = sld [smem:[#allocation15_spill]]  ;;  %p33_p4 = scmp.ge.s32.totalorder %s32_s13, 2 }
  0x22   : > { %s70_s19 = sadd.s32 1, %s4239_s23  ;;  %p77_p6 = scmp.ne.s32.totalorder %s4239_s23, %s4235_s22 }
  0x23   : > { %p78_p9 = scmp.eq.s32.totalorder %s4251_s26, 0  ;;  %s5101_s13 = smov (%p33_p4, %s32_s13), 0 }
  0x24   : > { %5086 = sst [smem:[#allocation14_spill]] %s5101_s13  ;;  %p4387_p13 = por %p4335_p2, %p77_p6 }
  0x25   : > { %p4381_p12 = por %p78_p9, %p77_p6  ;;  %s65_s28 = ssub.s32 %s4247_s25, %s5101_s13 }
  0x26   : > { %p3920_p0 = scmp.lt.s32.totalorder %s4251_s26, 2  ;;  %s247_s10 = sand.u32 1, %s4239_s23  }
  0x27   : > { %3910 = dma.hbm_to_vmem [thread:$0]  (!%p4360_p11), %s5085_s0, 2048, %s222_s11, [#allocation5], %s5073_s15, %s5073_s15, %s5074_s16  }
  0x28   : > { %p68_p11 = scmp.eq.s32.totalorder %s65_s28, 0  ;;  %s3392_s11 = sshll.u32 %s247_s10, 7 }
  0x29   : > { %s3495_s14 = sshll.u32 %s4247_s25, 11  ;;  %s251_s16 = scalar_lea.vmem [#allocation7], %s3392_s11 }
  0x2a   : > { %s4396_s12 = scalar_select %p68_p11, %s4239_s23, %s70_s19  }
  0x2b   : > { %s259_s15 = scalar_lea.hbm %s5066_s1, %s3495_s14  ;;  %s260_s0 = sshll.u32 %s251_s16, 4  ;;  %s261_s0 = int_to_ptr.vmem [resolvable:$true] %s260_s0 }
  0x2c   : > { %p4404_p2 = pnand %p3920_p0, %p4381_p12  ;;  %s248_s13 = scalar_lea.sflag [#allocation8], %s247_s10 }
  0x2d   : > { %s4152_s28 = scalar_lea.vmem %s261_s0, 2048  ;;  %s4256_s19 = smov [#allocation7]  }
  0x2e   : > { %p4141_p3 = pneg %p4404_p2  ;;  %p4153_p5 = scmp.ne.s32.totalorder %s261_s0, %s4152_s28 }
  0x2f   : > { %s4157_s25 = sshll.u32 %s4256_s19, 4  ;;  %s4158_s25 = int_to_ptr.vmem [resolvable:$false] %s4157_s25 }
  0x30   : > { %p4155_p7 = pnand %p4153_p5, %p4141_p3  ;;  %s4159_s14 = scalar_lea.vmem %s4158_s25, 4096 }
  0x31   : > { %p4160_p6 = scmp.lt.s32.totalorder %s261_s0, %s4158_s25  ;;  %p4161_p9 = scmp.lt.s32.totalorder %s4159_s14, %s4152_s28 }
  0x32   : > { %p4156_p4 = pneg %p4155_p7 }
  0x33   : > { %p4162_p11 = por %p4161_p9, %p4160_p6 }
  0x35   : > { %p4163_p10 = pnand %p4162_p11, %p4156_p4 }
  0x37   : > { %4166 = shalt.err (!%p4163_p10)
}
  0x38   : > { %s5090_s16 = smov 8   ;;  %s5091_s20 = smov 128  }
  0x39   : > { %3914 = dma.hbm_to_vmem [thread:$0]  (!%p4404_p2), %s259_s15, 2048, %s261_s0, %s248_s13, %s5091_s20, %s5091_s20, %s5090_s16  }
  0x3a   : > { %272 = sbr.rel (%p4351_p8) target bundleno = 1750 (0x6d6), region = 44 }
  0x3f   : > { %4218 = dma.done.wait (%p4331_p1), [#allocation5], 2048  }
  0x40   : > { %4220 = vsyncadd (%p4331_p1), [#allocation5], 4294965248  ;;  %s4422_s25 = sand.u32 1, %s4235_s22   ;;  %p5092_p10 = scmp.ne.s32.totalorder %s5081_s7, 0 }
  0x41   : > { %s3397_s10 = sshll.u32 %s4422_s25, 7  ;;  %s279_s11 = scalar_lea.sflag [#allocation8], %s4422_s25 }
  0x42   : > { %s4426_s17 = scalar_lea.vmem [#allocation7], %s3397_s10 }
  0x43   : > { %4222 = dma.done.wait (%p5092_p10), %s279_s11, 2048  }
  0x44   : > { %4224 = vsyncadd (%p5092_p10), %s279_s11, 4294965248  ;;  %s4432_s0 = scalar_lea.vmem [#allocation9], %s3397_s10  ;;  %p3399_p8 = scmp.ne.s32.totalorder %s4243_s24, 0 }
  0x46   : > { %318 = sbr.rel (%p3399_p8) target bundleno = 642 (0x282), region = 56 }
  0x4b   : > { %v3979_v0 = vld [vmem:[%s5067_s2] sm:$0xff]   ;;  %v322_v3 = vld [vmem:[#allocation4 + $0x8] sm:$0xff]  ;;  %vm348_vm0 = vcmask 130048   ;;  %v323_v7 = vld [vmem:[#allocation4 + $0x10] sm:$0xff]  ;;  %vm426_vm1 = vcmask 261120   ;;  %vm667_vm2 = vcmask 257024  }
  0x4c   : > { %v3980_v1 = vld [vmem:[%s5067_s2] sm:$0xff]   ;;  %3615 = vmatprep.subr.bf16.mxu0 %v3979_v0  ;;  %v695_v6 = vld [vmem:[#allocation4 + $0x48] sm:$0xff]  ;;  %v324_v8 = vld [vmem:[#allocation4 + $0x18] sm:$0xff] }
  0x4d   : > { %v321_v2 = vld [vmem:[#allocation4] sm:$0xff]  ;;  %3625 = vmatprep.subr.bf16.mxu1 %v3980_v1  ;;  %3616 = vmatpush3.bf16.msra.mxu0 %v3979_v0  ;;  %v330_v10 = vpack.c.bf16 %v324_v8, %v323_v7  ;;  %v696_v11 = vld [vmem:[#allocation4 + $0x50] sm:$0xff]  ;;  %v697_v12 = vld [vmem:[#allocation4 + $0x58] sm:$0xff] }
  0x4e   : > { %v694_v4 = vld [vmem:[#allocation4 + $0x40] sm:$0xff]  ;;  %v329_v5 = vpack.c.bf16 %v322_v3, %v321_v2  ;;  %3626 = vmatpush3.bf16.msra.mxu1 %v3980_v1  ;;  %v703_v14 = vpack.c.bf16 %v697_v12, %v696_v11  ;;  %v326_v15 = vld [vmem:[#allocation4 + $0x28] sm:$0xff]  ;;  %v327_v20 = vld [vmem:[#allocation4 + $0x30] sm:$0xff] }
  0x4f   : > { %v702_v9 = vpack.c.bf16 %v695_v6, %v694_v4  ;;  %v325_v13 = vld [vmem:[#allocation4 + $0x20] sm:$0xff]  ;;  %v699_v17 = vld [vmem:[#allocation4 + $0x68] sm:$0xff]  ;;  %v328_v21 = vld [vmem:[#allocation4 + $0x38] sm:$0xff] }
  0x50   : > { %3617 = vmatprep.mubr.msk.bf16.mxu0 %vm348_vm0, %v329_v5  ;;  %v698_v16 = vld [vmem:[#allocation4 + $0x60] sm:$0xff]  ;;  %v331_v18 = vpack.c.bf16 %v326_v15, %v325_v13  ;;  %v700_v22 = vld [vmem:[#allocation4 + $0x70] sm:$0xff]  ;;  %v701_v23 = vld [vmem:[#allocation4 + $0x78] sm:$0xff]  ;;  %v332_v24 = vpack.c.bf16 %v328_v21, %v327_v20 }
  0x51   : > { %3627 = vmatprep.mubr.msk.bf16.mxu1 %vm348_vm0, %v702_v9  ;;  %3618 = vmatmul.mubr.msk.bf16.vlgmr.msra.gmra.mxu0 %vm348_vm0, %v330_v10  ;;  %v704_v19 = vpack.c.bf16 %v699_v17, %v698_v16  ;;  %v705_v25 = vpack.c.bf16 %v701_v23, %v700_v22  ;;  %v4452_v26 = vld [vmem:[%s5068_s3] ss:$0 sm:$0xff] }
  0x52   : > { %3628 = vmatmul.mubr.msk.bf16.vlgmr.msra.gmra.mxu1 %vm348_vm0, %v703_v14  ;;  %3621 = vmatprep.mubr.msk.bf16.mxu0 %vm348_vm0, %v331_v18 }
  0x53   : > { %3631 = vmatprep.mubr.msk.bf16.mxu1 %vm348_vm0, %v704_v19 }
  0x59   : > { %3622 = vmatmul.mubr.msk.bf16.gmra.mxu0 %vm348_vm0, %v332_v24 }
  0x5a   : > { %3632 = vmatmul.mubr.msk.bf16.gmra.mxu1 %vm348_vm0, %v705_v25 }
 0x111   : > { %v3619_v27 = vpop.f32.mrf.mxu0 }
 0x112   : > { %v4455_v28 = vadd.f32 %v3619_v27, %v4452_v26  ;;  %v3629_v29 = vpop.f32.mrf.mxu1 }
 0x113   : > { %v4458_v30 = vadd.f32 %v3629_v29, %v4452_v26  ;;  %v395_v31 = vpop.f32.mrf.mxu0 }
 0x114   : > { %v4461_v32 = vadd.f32 %v4452_v26, %v395_v31  ;;  %v767_v33 = vpop.f32.mrf.mxu1  ;;  %v433_v34 = vsel %vm426_vm1, %v4455_v28, -inf }
 0x115   : > { %v4466_v35 = vadd.f32 %v4452_v26, %v767_v33  ;;  %v804_v36 = vsel %vm426_vm1, %v4458_v30, -inf  ;;  %434 = vmax.xlane.f32.xlu1 %v433_v34  ;;  %v527_v37 = vrot.slane %v433_v34, 4  ;;  %v3620_v38 = vpop.f32.mrf.mxu0 }
 0x116   : > { %805 = vmax.xlane.f32.xlu0 %v804_v36  ;;  %v898_v39 = vrot.slane %v804_v36, 4  ;;  %v3630_v40 = vpop.f32.mrf.mxu1  ;;  %v4471_v41 = vadd.f32 %v3620_v38, %v4452_v26  ;;  %v427_v42 = vsel %vm426_vm1, %v4461_v32, -inf }
 0x117   : > { %v4476_v43 = vadd.f32 %v3630_v40, %v4452_v26  ;;  %v528_v44 = vmax.f32 %v433_v34, %v527_v37  ;;  %v398_v45 = vpop.f32.mrf.mxu0  ;;  %v515_v46 = vrot.slane %v427_v42, 4  ;;  %v798_v47 = vsel %vm426_vm1, %v4466_v35, -inf }
 0x118   : > { %v899_v48 = vmax.f32 %v804_v36, %v898_v39  ;;  %v4481_v49 = vadd.f32 %v4452_v26, %v398_v45  ;;  %v770_v50 = vpop.f32.mrf.mxu1  ;;  %v436_v51 = vsel %vm426_vm1, %v4471_v41, -inf  ;;  %v886_v52 = vrot.slane %v798_v47, 4 }
 0x119   : > { %v529_v53 = vrot.slane %v528_v44, 2  ;;  %v4486_v54 = vadd.f32 %v4452_v26, %v770_v50  ;;  %437 = vmax.xlane.f32.xlu1 %v436_v51  ;;  %v533_v55 = vrot.slane %v436_v51, 4  ;;  %v3623_v56 = vpop.f32.mrf.mxu0  ;;  %v516_v57 = vmax.f32 %v427_v42, %v515_v46 }
 0x11a   : > { %v900_v58 = vrot.slane %v899_v48, 2  ;;  %v3633_v59 = vpop.f32.mrf.mxu1  ;;  %v4489_v60 = vadd.f32 %v3623_v56, %v4452_v26  ;;  %428 = vmax.xlane.f32.xlu0 %v427_v42  ;;  %v807_v61 = vsel %vm426_vm1, %v4476_v43, -inf  ;;  %v887_v62 = vmax.f32 %v798_v47, %v886_v52 }
 0x11b   : > { %v530_v63 = vmax.f32 %v528_v44, %v529_v53  ;;  %v4494_v0 = vadd.f32 %v3633_v59, %v4452_v26  ;;  %v534_v1 = vmax.f32 %v436_v51, %v533_v55  ;;  %v517_v2 = vrot.slane %v516_v57, 2  ;;  %v411_v3 = vpop.f32.mrf.mxu0 }
 0x11c   : > { %v901_v4 = vmax.f32 %v899_v48, %v900_v58  ;;  %v4497_v5 = vadd.f32 %v4452_v26, %v411_v3  ;;  %v783_v6 = vpop.f32.mrf.mxu1  ;;  %v904_v7 = vrot.slane %v807_v61, 4  ;;  %v888_v8 = vrot.slane %v887_v62, 2 }
 0x11d   : > { %v531_v9 = vrot.slane %v530_v63, 1  ;;  %v535_v10 = vrot.slane %v534_v1, 2  ;;  %v518_v11 = vmax.f32 %v516_v57, %v517_v2  ;;  %v4500_v12 = vadd.f32 %v4452_v26, %v783_v6  ;;  %808 = vmax.xlane.f32.xlu1 %v807_v61  ;;  %v3624_v13 = vpop.f32.mrf.mxu0 }
 0x11e   : > { %v902_v14 = vrot.slane %v901_v4, 1  ;;  %v3634_v15 = vpop.f32.mrf.mxu1  ;;  %v905_v16 = vmax.f32 %v807_v61, %v904_v7  ;;  %v4503_v17 = vadd.f32 %v3624_v13, %v4452_v26  ;;  %v889_v18 = vmax.f32 %v887_v62, %v888_v8  ;;  %799 = vmax.xlane.f32.xlu0 %v798_v47 }
 0x11f   : > { %v532_v19 = vmax.f32 %v530_v63, %v531_v9  ;;  %v536_v20 = vmax.f32 %v534_v1, %v535_v10  ;;  %v519_v21 = vrot.slane %v518_v11, 1  ;;  %v4506_v22 = vadd.f32 %v3634_v15, %v4452_v26  ;;  %v414_v23 = vpop.f32.mrf.mxu0 }
 0x120   : > { %v903_v24 = vmax.f32 %v901_v4, %v902_v14  ;;  %v906_v25 = vrot.slane %v905_v16, 2  ;;  %v890_v27 = vrot.slane %v889_v18, 1  ;;  %v4509_v29 = vadd.f32 %v4452_v26, %v414_v23  ;;  %v786_v31 = vpop.f32.mrf.mxu1 }
 0x121   : > { %v565_v33 = vsub.f32 %v4455_v28, %v532_v19  ;;  %v537_v34 = vrot.slane %v536_v20, 1  ;;  %v520_v36 = vmax.f32 %v518_v11, %v519_v21  ;;  %v4513_v37 = vadd.f32 %v4452_v26, %v786_v31 }
 0x122   : > { %v936_v38 = vsub.f32 %v4458_v30, %v903_v24  ;;  %v907_v39 = vmax.f32 %v905_v16, %v906_v25  ;;  %v891_v40 = vmax.f32 %v889_v18, %v890_v27  ;;  %v801_v42 = vsel %vm426_vm1, %v4486_v54, -inf }
 0x123   : > { %v575_v44 = vmul.f32 1.442695, %v565_v33  ;;  %v538_v45 = vmax.f32 %v536_v20, %v537_v34  ;;  %v563_v46 = vsub.f32 %v4461_v32, %v520_v36  ;;  %v892_v47 = vrot.slane %v801_v42, 4  ;;  %802 = vmax.xlane.f32.xlu1 %v801_v42 }
 0x124   : > { %v946_v48 = vmul.f32 1.442695, %v936_v38  ;;  %v908_v50 = vrot.slane %v907_v39, 1  ;;  %v934_v51 = vsub.f32 %v4466_v35, %v891_v40  ;;  %v430_v26 = vsel %vm426_vm1, %v4481_v49, -inf }
 0x125   : > { %3981 = vpow2.f32 %v575_v44  ;;  %v566_v52 = vsub.f32 %v4471_v41, %v538_v45  ;;  %v571_v53 = vmul.f32 1.442695, %v563_v46  ;;  %v893_v55 = vmax.f32 %v801_v42, %v892_v47  ;;  %431 = vmax.xlane.f32.xlu0 %v430_v26 }
 0x126   : > { %3983 = vpow2.f32 %v946_v48  ;;  %v909_v56 = vmax.f32 %v907_v39, %v908_v50  ;;  %v942_v57 = vmul.f32 1.442695, %v934_v51  ;;  %v521_v58 = vrot.slane %v430_v26, 4 }
 0x127   : > { %v577_v59 = vmul.f32 1.442695, %v566_v52  ;;  %3985 = vpow2.f32 %v571_v53  ;;  %v894_v61 = vrot.slane %v893_v55, 2  ;;  %v448_v62 = vsel %vm426_vm1, %v4503_v17, -inf }
 0x128   : > { %v937_v63 = vsub.f32 %v4476_v43, %v909_v56  ;;  %3987 = vpow2.f32 %v942_v57  ;;  %v522_v1 = vmax.f32 %v430_v26, %v521_v58  ;;  %449 = vmax.xlane.f32.xlu1 %v448_v62  ;;  %v557_v2 = vrot.slane %v448_v62, 4 }
 0x129   : > { %3989 = vpow2.f32 %v577_v59  ;;  %v895_v3 = vmax.f32 %v893_v55, %v894_v61  ;;  %v445_v4 = vsel %vm426_vm1, %v4489_v60, -inf  ;;  %v442_v6 = vsel %vm426_vm1, %v4509_v29, -inf }
 0x12a   : > { %v948_v7 = vmul.f32 1.442695, %v937_v63  ;;  %v523_v8 = vrot.slane %v522_v1, 2  ;;  %v558_v9 = vmax.f32 %v448_v62, %v557_v2  ;;  %v551_v10 = vrot.slane %v445_v4, 4  ;;  %446 = vmax.xlane.f32.xlu0 %v445_v4 }
 0x12b   : > { %v896_v11 = vrot.slane %v895_v3, 1  ;;  %v545_v13 = vrot.slane %v442_v6, 4  ;;  %v439_v14 = vsel %vm426_vm1, %v4497_v5, -inf  ;;  %v813_v15 = vsel %vm426_vm1, %v4513_v37, -inf }
 0x12c   : > { %3991 = vpow2.f32 %v948_v7  ;;  %v524_v16 = vmax.f32 %v522_v1, %v523_v8  ;;  %v559_v18 = vrot.slane %v558_v9, 2  ;;  %v552_v19 = vmax.f32 %v445_v4, %v551_v10  ;;  %443 = vmax.xlane.f32.xlu1 %v442_v6 }
 0x12d   : > { %v897_v20 = vmax.f32 %v895_v3, %v896_v11  ;;  %v546_v21 = vmax.f32 %v442_v6, %v545_v13  ;;  %v539_v23 = vrot.slane %v439_v14, 4  ;;  %v916_v24 = vrot.slane %v813_v15, 4 }
 0x12e   : > { %v525_v25 = vrot.slane %v524_v16, 1  ;;  %v560_v27 = vmax.f32 %v558_v9, %v559_v18  ;;  %v553_v31 = vrot.slane %v552_v19, 2  ;;  %440 = vmax.xlane.f32.xlu0 %v439_v14  ;;  %v810_v33 = vsel %vm426_vm1, %v4500_v12, -inf }
 0x12f   : > { %v935_v34 = vsub.f32 %v4486_v54, %v897_v20  ;;  %v547_v36 = vrot.slane %v546_v21, 2  ;;  %v540_v38 = vmax.f32 %v439_v14, %v539_v23  ;;  %v4537_v39 = vmax.f32 %v813_v15, %v916_v24 }
 0x130   : > { %v526_v40 = vmax.f32 %v524_v16, %v525_v25  ;;  %v561_v42 = vrot.slane %v560_v27, 1  ;;  %v554_v44 = vmax.f32 %v552_v19, %v553_v31  ;;  %814 = vmax.xlane.f32.xlu1 %v813_v15  ;;  %v910_v45 = vrot.slane %v810_v33, 4 }
 0x131   : > { %v944_v46 = vmul.f32 1.442695, %v935_v34  ;;  %v548_v47 = vmax.f32 %v546_v21, %v547_v36  ;;  %v541_v48 = vrot.slane %v540_v38, 2  ;;  %v918_v50 = vrot.slane %v4537_v39, 2 }
 0x132   : > { %v4540_v51 = vpop.eup %3981  ;;  %v564_v26 = vsub.f32 %v4481_v49, %v526_v40  ;;  %v562_v52 = vmax.f32 %v560_v27, %v561_v42  ;;  %v555_v53 = vrot.slane %v554_v44, 1  ;;  %v4543_v55 = vmax.f32 %v810_v33, %v910_v45  ;;  %811 = vmax.xlane.f32.xlu0 %v810_v33 }
 0x133   : > { %v4545_v56 = vpop.eup %3983  ;;  %v601_v57 = vsel %vm426_vm1, %v4540_v51, 0.0  ;;  %3993 = vpow2.f32 %v944_v46  ;;  %v549_v58 = vrot.slane %v548_v47, 1  ;;  %v4549_v59 = vmax.f32 %v540_v38, %v541_v48 }
 0x134   : > { %v4551_v61 = vpop.eup %3985  ;;  %v972_v62 = vsel %vm426_vm1, %v4545_v56, 0.0  ;;  %v602_v63 = vrot.slane %v601_v57, 4  ;;  %v573_v1 = vmul.f32 1.442695, %v564_v26  ;;  %v570_v2 = vsub.f32 %v4503_v17, %v562_v52 }
 0x135   : > { %v4556_v3 = vpop.eup %3987  ;;  %v973_v4 = vrot.slane %v972_v62, 4  ;;  %v587_v6 = vsel %vm426_vm1, %v4551_v61, 0.0  ;;  %v556_v7 = vmax.f32 %v554_v44, %v555_v53  ;;  %v550_v8 = vmax.f32 %v548_v47, %v549_v58 }
 0x136   : > { %v4560_v9 = vpop.eup %3989  ;;  %v603_v10 = vadd.f32 %v602_v63, %v601_v57  ;;  %v588_v11 = vrot.slane %v587_v6, 4  ;;  %v958_v13 = vsel %vm426_vm1, %v4556_v3, 0.0  ;;  %3995 = vpow2.f32 %v573_v1 }
 0x137   : > { %v974_v14 = vadd.f32 %v973_v4, %v972_v62  ;;  %v608_v15 = vsel %vm426_vm1, %v4560_v9, 0.0  ;;  %v959_v16 = vrot.slane %v958_v13, 4  ;;  %v585_v18 = vmul.f32 1.442695, %v570_v2 }
 0x138   : > { %v604_v19 = vrot.slane %v603_v10, 2  ;;  %v609_v20 = vrot.slane %v608_v15, 4  ;;  %v589_v21 = vadd.f32 %v588_v11, %v587_v6  ;;  %v569_v23 = vsub.f32 %v4489_v60, %v556_v7 }
 0x139   : > { %v4567_v24 = vpop.eup %3991  ;;  %v975_v25 = vrot.slane %v974_v14, 2  ;;  %v960_v27 = vadd.f32 %v959_v16, %v958_v13  ;;  %3997 = vpow2.f32 %v585_v18  ;;  %v568_v31 = vsub.f32 %v4509_v29, %v550_v8 }
 0x13a   : > { %v605_v33 = vadd.f32 %v604_v19, %v603_v10  ;;  %v610_v34 = vadd.f32 %v609_v20, %v608_v15  ;;  %v590_v36 = vrot.slane %v589_v21, 2  ;;  %v979_v38 = vsel %vm426_vm1, %v4567_v24, 0.0 }
 0x13b   : > { %v976_v40 = vadd.f32 %v975_v25, %v974_v14  ;;  %v980_v42 = vrot.slane %v979_v38, 4  ;;  %v961_v44 = vrot.slane %v960_v27, 2  ;;  %v583_v45 = vmul.f32 1.442695, %v569_v23 }
 0x13c   : > { %v606_v46 = vrot.slane %v605_v33, 1  ;;  %v611_v47 = vrot.slane %v610_v34, 2  ;;  %v591_v48 = vadd.f32 %v590_v36, %v589_v21  ;;  %v581_v26 = vmul.f32 1.442695, %v568_v31 }
 0x13d   : > { %v977_v52 = vrot.slane %v976_v40, 1  ;;  %v981_v53 = vadd.f32 %v980_v42, %v979_v38  ;;  %v962_v57 = vadd.f32 %v961_v44, %v960_v27  ;;  %3999 = vpow2.f32 %v583_v45 }
 0x13e   : > { %v607_v58 = vadd.f32 %v606_v46, %v605_v33  ;;  %v612_v62 = vadd.f32 %v611_v47, %v610_v34  ;;  %v592_v63 = vrot.slane %v591_v48, 1  ;;  %4001 = vpow2.f32 %v581_v26 }
 0x13f   : > { %v978_v1 = vadd.f32 %v977_v52, %v976_v40  ;;  %v982_v2 = vrot.slane %v981_v53, 2  ;;  %v963_v4 = vrot.slane %v962_v57, 1  ;;  %v543_v6 = vrot.slane %v4549_v59, 1 }
 0x140   : > { %v4573_v7 = vpop.eup %3993  ;;  %4003 = vrcp.f32 %v607_v58  ;;  %v613_v8 = vrot.slane %v612_v62, 1  ;;  %v593_v10 = vadd.f32 %v592_v63, %v591_v48  ;;  %v919_v11 = vmax.f32 %v4537_v39, %v918_v50 }
 0x141   : > { %4005 = vrcp.f32 %v978_v1  ;;  %v983_v13 = vadd.f32 %v982_v2, %v981_v53  ;;  %v964_v14 = vadd.f32 %v963_v4, %v962_v57  ;;  %v965_v15 = vsel %vm426_vm1, %v4573_v7, 0.0 }
 0x142   : > { %v614_v16 = vadd.f32 %v613_v8, %v612_v62  ;;  %4007 = vrcp.f32 %v593_v10  ;;  %v966_v18 = vrot.slane %v965_v15, 4  ;;  %v544_v19 = vmax.f32 %v4549_v59, %v543_v6 }
 0x143   : > { %v4581_v20 = vpop.eup %3995  ;;  %v984_v21 = vrot.slane %v983_v13, 1  ;;  %4009 = vrcp.f32 %v964_v14  ;;  %v920_v23 = vrot.slane %v919_v11, 1  ;;  %v912_v25 = vrot.slane %v4543_v55, 2 }
 0x144   : > { %4011 = vrcp.f32 %v614_v16  ;;  %v967_v39 = vadd.f32 %v966_v18, %v965_v15  ;;  %v594_v50 = vsel %vm426_vm1, %v4581_v20, 0.0  ;;  %v567_v27 = vsub.f32 %v4497_v5, %v544_v19 }
 0x145   : > { %v985_v31 = vadd.f32 %v984_v21, %v983_v13  ;;  %v595_v33 = vrot.slane %v594_v50, 4  ;;  %v921_v34 = vmax.f32 %v919_v11, %v920_v23  ;;  %v913_v36 = vmax.f32 %v4543_v55, %v912_v25 }
 0x146   : > { %v4588_v59 = vpop.eup %3997  ;;  %v968_v38 = vrot.slane %v967_v39, 2  ;;  %v579_v40 = vmul.f32 1.442695, %v567_v27  ;;  %v819_v42 = vsel %vm426_vm1, %v4506_v22, -inf  ;;  %v4594_v44 = vsel %vm426_vm1, %v4494_v0, -inf }
 0x147   : > { %4013 = vrcp.f32 %v985_v31  ;;  %v596_v45 = vadd.f32 %v595_v33, %v594_v50  ;;  %v636_v46 = vsel %vm426_vm1, %v4588_v59, 0.0  ;;  %v939_v47 = vsub.f32 %v4513_v37, %v921_v34  ;;  %820 = vmax.xlane.f32.xlu1 %v819_v42  ;;  %817 = vmax.xlane.f32.xlu0 %v4594_v44 }
 0x148   : > { %v969_v55 = vadd.f32 %v968_v38, %v967_v39  ;;  %v637_v48 = vrot.slane %v636_v46, 4  ;;  %4015 = vpow2.f32 %v579_v40  ;;  %v914_v26 = vrot.slane %v913_v36, 1 }
 0x149   : > { %v597_v52 = vrot.slane %v596_v45, 2  ;;  %v952_v53 = vmul.f32 1.442695, %v939_v47  ;;  %v928_v57 = vrot.slane %v819_v42, 4  ;;  %v922_v2 = vrot.slane %v4594_v44, 4 }
 0x14a   : > { %v4600_v58 = vpop.eup %3999  ;;  %v970_v62 = vrot.slane %v969_v55, 1  ;;  %v638_v63 = vadd.f32 %v637_v48, %v636_v46  ;;  %v915_v1 = vmax.f32 %v913_v36, %v914_v26 }
 0x14b   : > { %v4603_v4 = vpop.eup %4001  ;;  %v598_v6 = vadd.f32 %v597_v52, %v596_v45  ;;  %v629_v8 = vsel %vm426_vm1, %v4600_v58, 0.0  ;;  %4017 = vpow2.f32 %v952_v53  ;;  %v929_v10 = vmax.f32 %v819_v42, %v928_v57 }
 0x14c   : > { %v971_v11 = vadd.f32 %v970_v62, %v969_v55  ;;  %v639_v13 = vrot.slane %v638_v63, 2  ;;  %v630_v14 = vrot.slane %v629_v8, 4  ;;  %v622_v15 = vsel %vm426_vm1, %v4603_v4, 0.0 }
 0x14d   : > { %v4004_v16 = vpop.eup %4003  ;;  %v599_v18 = vrot.slane %v598_v6, 1  ;;  %v623_v19 = vrot.slane %v622_v15, 4  ;;  %v938_v21 = vsub.f32 %v4500_v12, %v915_v1  ;;  %v930_v23 = vrot.slane %v929_v10, 2 }
 0x14e   : > { %v4006_v25 = vpop.eup %4005  ;;  %v653_v39 = vmul.f32 %v4004_v16, %v4540_v51  ;;  %4019 = vrcp.f32 %v971_v11  ;;  %v640_v50 = vadd.f32 %v639_v13, %v638_v63  ;;  %v631_v27 = vadd.f32 %v630_v14, %v629_v8 }
 0x14f   : > { %v4008_v31 = vpop.eup %4007  ;;  %v1024_v33 = vmul.f32 %v4006_v25, %v4545_v56  ;;  %v600_v34 = vadd.f32 %v599_v18, %v598_v6  ;;  %v624_v36 = vadd.f32 %v623_v19, %v622_v15  ;;  %v950_v38 = vmul.f32 1.442695, %v938_v21 }
 0x150   : > { %v4010_v40 = vpop.eup %4009  ;;  %v678_v42 = vpack.c.bf16 %v653_v39, %v653_v39  ;;  %v651_v45 = vmul.f32 %v4008_v31, %v4551_v61  ;;  %v641_v46 = vrot.slane %v640_v50, 1  ;;  %v632_v47 = vrot.slane %v631_v27, 2 }
 0x151   : > { %v4012_v55 = vpop.eup %4011  ;;  %v1049_v48 = vpack.c.bf16 %v1024_v33, %v1024_v33  ;;  %v1022_v26 = vmul.f32 %v4010_v40, %v4556_v3  ;;  %4021 = vrcp.f32 %v600_v34  ;;  %v625_v51 = vrot.slane %v624_v36, 2 }
 0x152   : > { %686 = vst.msk [vmem:[#allocation3 + $0x8] sm:$0xf] %vm667_vm2, %v678_v42  ;;  %v654_v52 = vmul.f32 %v4012_v55, %v4560_v9  ;;  %v676_v56 = vpack.c.bf16 %v651_v45, %v651_v45  ;;  %v642_v53 = vadd.f32 %v641_v46, %v640_v50  ;;  %v633_v57 = vadd.f32 %v632_v47, %v631_v27 }
 0x153   : > { %1058 = vst.msk [vmem:[#allocation3 + $0x28] sm:$0xf] %vm667_vm2, %v1049_v48  ;;  %v1047_v62 = vpack.c.bf16 %v1022_v26, %v1022_v26  ;;  %v626_v63 = vadd.f32 %v625_v51, %v624_v36  ;;  %4023 = vpow2.f32 %v950_v38  ;;  %v931_v61 = vmax.f32 %v929_v10, %v930_v23 }
 0x154   : > { %v4014_v1 = vpop.eup %4013  ;;  %v679_v6 = vpack.c.bf16 %v654_v52, %v654_v52  ;;  %684 = vst.msk [vmem:[#allocation3] sm:$0xf] %vm667_vm2, %v676_v56  ;;  %4025 = vrcp.f32 %v642_v53  ;;  %v634_v3 = vrot.slane %v633_v57, 1  ;;  %v923_v8 = vmax.f32 %v4594_v44, %v922_v2 }
 0x155   : > { %v4619_v11 = vpop.eup %4015  ;;  %v1025_v9 = vmul.f32 %v4014_v1, %v4567_v24  ;;  %1056 = vst.msk [vmem:[#allocation3 + $0x20] sm:$0xf] %vm667_vm2, %v1047_v62  ;;  %v627_v13 = vrot.slane %v626_v63, 1  ;;  %v932_v14 = vrot.slane %v931_v61, 1 }
 0x156   : > { %687 = vst.msk [vmem:[#allocation3 + $0xc] sm:$0xf] %vm667_vm2, %v679_v6  ;;  %v635_v15 = vadd.f32 %v634_v3, %v633_v57  ;;  %v615_v10 = vsel %vm426_vm1, %v4619_v11, 0.0  ;;  %v924_v16 = vrot.slane %v923_v8, 2 }
 0x157   : > { %v1050_v18 = vpack.c.bf16 %v1025_v9, %v1025_v9  ;;  %v628_v19 = vadd.f32 %v627_v13, %v626_v63  ;;  %v616_v21 = vrot.slane %v615_v10, 4  ;;  %v933_v23 = vmax.f32 %v931_v61, %v932_v14 }
 0x158   : > { %v4626_v44 = vpop.eup %4017  ;;  %4027 = vrcp.f32 %v635_v15  ;;  %v925_v2 = vmax.f32 %v923_v8, %v924_v16 }
 0x159   : > { %1059 = vst.msk [vmem:[#allocation3 + $0x2c] sm:$0xf] %vm667_vm2, %v1050_v18  ;;  %4029 = vrcp.f32 %v628_v19  ;;  %v617_v24 = vadd.f32 %v616_v21, %v615_v10  ;;  %v993_v25 = vsel %vm426_vm1, %v4626_v44, 0.0  ;;  %v941_v39 = vsub.f32 %v4506_v22, %v933_v23 }
 0x15a   : > { %v994_v50 = vrot.slane %v993_v25, 4  ;;  %v926_v27 = vrot.slane %v925_v2, 1 }
 0x15b   : > { %v4020_v31 = vpop.eup %4019  ;;  %v618_v33 = vrot.slane %v617_v24, 2  ;;  %v956_v34 = vmul.f32 1.442695, %v941_v39 }
 0x15c   : > { %v1023_v36 = vmul.f32 %v4020_v31, %v4573_v7  ;;  %v995_v38 = vadd.f32 %v994_v50, %v993_v25  ;;  %v927_v40 = vmax.f32 %v925_v2, %v926_v27 }
 0x15d   : > { %v619_v42 = vadd.f32 %v618_v33, %v617_v24  ;;  %4031 = vpow2.f32 %v956_v34 }
 0x15e   : > { %v4022_v45 = vpop.eup %4021  ;;  %v1048_v46 = vpack.c.bf16 %v1023_v36, %v1023_v36  ;;  %v996_v47 = vrot.slane %v995_v38, 2  ;;  %v940_v55 = vsub.f32 %v4494_v0, %v927_v40 }
 0x15f   : > { %v652_v48 = vmul.f32 %v4022_v45, %v4581_v20  ;;  %v620_v26 = vrot.slane %v619_v42, 1 }
 0x160   : > { %v4024_v51 = vpop.eup %4023  ;;  %1057 = vst.msk [vmem:[#allocation3 + $0x24] sm:$0xf] %vm667_vm2, %v1048_v46  ;;  %v997_v52 = vadd.f32 %v996_v47, %v995_v38  ;;  %v954_v56 = vmul.f32 1.442695, %v940_v55 }
 0x161   : > { %v4026_v53 = vpop.eup %4025  ;;  %v677_v57 = vpack.c.bf16 %v652_v48, %v652_v48  ;;  %v621_v7 = vadd.f32 %v620_v26, %v619_v42  ;;  %v986_v62 = vsel %vm426_vm1, %v4024_v51, 0.0 }
 0x162   : > { %v658_v63 = vmul.f32 %v4026_v53, %v4588_v59  ;;  %v998_v61 = vrot.slane %v997_v52, 1  ;;  %v987_v1 = vrot.slane %v986_v62, 4  ;;  %4033 = vpow2.f32 %v954_v56 }
 0x163   : > { %685 = vst.msk [vmem:[#allocation3 + $0x4] sm:$0xf] %vm667_vm2, %v677_v57  ;;  %4035 = vrcp.f32 %v621_v7 }
 0x164   : > { %v683_v20 = vpack.c.bf16 %v658_v63, %v658_v63  ;;  %v999_v6 = vadd.f32 %v998_v61, %v997_v52  ;;  %v988_v3 = vadd.f32 %v987_v1, %v986_v62 }
 0x165   : > { %v4028_v8 = vpop.eup %4027 }
 0x166   : > { %v4030_v9 = vpop.eup %4029  ;;  %691 = vst.msk [vmem:[#allocation3 + $0x1c] sm:$0xf] %vm667_vm2, %v683_v20  ;;  %v657_v13 = vmul.f32 %v4028_v8, %v4600_v58  ;;  %4037 = vrcp.f32 %v999_v6  ;;  %v989_v14 = vrot.slane %v988_v3, 2 }
 0x167   : > { %v656_v15 = vmul.f32 %v4030_v9, %v4603_v4 }
 0x168   : > { %v682_v59 = vpack.c.bf16 %v657_v13, %v657_v13  ;;  %v990_v10 = vadd.f32 %v989_v14, %v988_v3 }
 0x169   : > { %v681_v16 = vpack.c.bf16 %v656_v15, %v656_v15 }
 0x16a   : > { %v4032_v18 = vpop.eup %4031  ;;  %690 = vst.msk [vmem:[#allocation3 + $0x18] sm:$0xf] %vm667_vm2, %v682_v59  ;;  %v991_v19 = vrot.slane %v990_v10, 1 }
 0x16b   : > { %689 = vst.msk [vmem:[#allocation3 + $0x14] sm:$0xf] %vm667_vm2, %v681_v16  ;;  %v1007_v21 = vsel %vm426_vm1, %v4032_v18, 0.0 }
 0x16c   : > { %v992_v23 = vadd.f32 %v991_v19, %v990_v10  ;;  %v1008_v2 = vrot.slane %v1007_v21, 4 }
 0x16e   : > { %4039 = vrcp.f32 %v992_v23  ;;  %v1009_v24 = vadd.f32 %v1008_v2, %v1007_v21 }
 0x16f   : > { %v4034_v58 = vpop.eup %4033 }
 0x170   : > { %v4036_v25 = vpop.eup %4035  ;;  %v1010_v39 = vrot.slane %v1009_v24, 2  ;;  %v1000_v4 = vsel %vm426_vm1, %v4034_v58, 0.0 }
 0x171   : > { %v655_v50 = vmul.f32 %v4036_v25, %v4619_v11  ;;  %v1001_v27 = vrot.slane %v1000_v4, 4 }
 0x172   : > { %v1011_v31 = vadd.f32 %v1010_v39, %v1009_v24 }
 0x173   : > { %v4038_v33 = vpop.eup %4037  ;;  %v680_v34 = vpack.c.bf16 %v655_v50, %v655_v50  ;;  %v1002_v36 = vadd.f32 %v1001_v27, %v1000_v4 }
 0x174   : > { %v1027_v38 = vmul.f32 %v4038_v33, %v4626_v44  ;;  %v1012_v40 = vrot.slane %v1011_v31, 1 }
 0x175   : > { %688 = vst.msk [vmem:[#allocation3 + $0x10] sm:$0xf] %vm667_vm2, %v680_v34  ;;  %v1003_v42 = vrot.slane %v1002_v36, 2 }
 0x176   : > { %v1052_v45 = vpack.c.bf16 %v1027_v38, %v1027_v38  ;;  %v1013_v46 = vadd.f32 %v1012_v40, %v1011_v31 }
 0x177   : > { %v1004_v47 = vadd.f32 %v1003_v42, %v1002_v36 }
 0x178   : > { %1061 = vst.msk [vmem:[#allocation3 + $0x34] sm:$0xf] %vm667_vm2, %v1052_v45  ;;  %4041 = vrcp.f32 %v1013_v46 }
 0x179   : > { %v1005_v55 = vrot.slane %v1004_v47, 1 }
 0x17b   : > { %v4040_v48 = vpop.eup %4039  ;;  %v1006_v11 = vadd.f32 %v1005_v55, %v1004_v47 }
 0x17c   : > { %v1026_v26 = vmul.f32 %v4040_v48, %v4024_v51 }
 0x17d   : > { %4043 = vrcp.f32 %v1006_v11 }
 0x17e   : > { %v1051_v52 = vpack.c.bf16 %v1026_v26, %v1026_v26 }
 0x180   : > { %1060 = vst.msk [vmem:[#allocation3 + $0x30] sm:$0xf] %vm667_vm2, %v1051_v52 }
 0x185   : > { %v4042_v56 = vpop.eup %4041 }
 0x186   : > { %v1029_v44 = vmul.f32 %v4042_v56, %v4032_v18 }
 0x188   : > { %v1054_v53 = vpack.c.bf16 %v1029_v44, %v1029_v44 }
 0x18a   : > { %v4044_v57 = vpop.eup %4043  ;;  %1063 = vst.msk [vmem:[#allocation3 + $0x3c] sm:$0xf] %vm667_vm2, %v1054_v53 }
 0x18b   : > { %v1028_v7 = vmul.f32 %v4044_v57, %v4034_v58 }
 0x18d   : > { %v1053_v62 = vpack.c.bf16 %v1028_v7, %v1028_v7 }
 0x18f   : > { %1062 = vst.msk [vmem:[#allocation3 + $0x38] sm:$0xf] %vm667_vm2, %v1053_v62 }
 0x19e   : > { %v435_v63 = vpop.xlane.xlu1 %434 }
 0x19f   : > { %v806_v61 = vpop.xlane.xlu0 %805  ;;  %v453_v1 = vsub.f32 %v4455_v28, %v435_v63 }
 0x1a0   : > { %v824_v51 = vsub.f32 %v4458_v30, %v806_v61 }
 0x1a1   : > { %v463_v20 = vmul.f32 1.442695, %v453_v1 }
 0x1a2   : > { %v834_v6 = vmul.f32 1.442695, %v824_v51  ;;  %v438_v3 = vpop.xlane.xlu1 %437 }
 0x1a3   : > { %4045 = vpow2.f32 %v463_v20  ;;  %v454_v8 = vsub.f32 %v4471_v41, %v438_v3  ;;  %v429_v9 = vpop.xlane.xlu0 %428 }
 0x1a4   : > { %v451_v13 = vsub.f32 %v4461_v32, %v429_v9  ;;  %4047 = vpow2.f32 %v834_v6 }
 0x1a5   : > { %v465_v14 = vmul.f32 1.442695, %v454_v8 }
 0x1a6   : > { %v459_v15 = vmul.f32 1.442695, %v451_v13  ;;  %v809_v59 = vpop.xlane.xlu1 %808 }
 0x1a7   : > { %4049 = vpow2.f32 %v465_v14  ;;  %v825_v10 = vsub.f32 %v4476_v43, %v809_v59  ;;  %v800_v16 = vpop.xlane.xlu0 %799 }
 0x1a8   : > { %v822_v28 = vsub.f32 %v4466_v35, %v800_v16  ;;  %4051 = vpow2.f32 %v459_v15 }
 0x1a9   : > { %v836_v30 = vmul.f32 1.442695, %v825_v10 }
 0x1aa   : > { %v830_v18 = vmul.f32 1.442695, %v822_v28 }
 0x1ab   : > { %4053 = vpow2.f32 %v836_v30 }
 0x1ac   : > { %v803_v19 = vpop.xlane.xlu1 %802  ;;  %4055 = vpow2.f32 %v830_v18 }
 0x1ad   : > { %v823_v41 = vsub.f32 %v4486_v54, %v803_v19 }
 0x1ae   : > { %v432_v21 = vpop.xlane.xlu0 %431 }
 0x1af   : > { %v452_v32 = vsub.f32 %v4481_v49, %v432_v21  ;;  %v832_v2 = vmul.f32 1.442695, %v823_v41 }
 0x1b0   : > { %v4661_v23 = vpop.eup %4045 }
 0x1b1   : > { %v461_v24 = vmul.f32 1.442695, %v452_v32  ;;  %v450_v58 = vpop.xlane.xlu1 %449  ;;  %v481_v43 = vsel %vm426_vm1, %v4661_v23, 0.0  ;;  %v4665_v35 = vpop.eup %4047 }
 0x1b2   : > { %v458_v25 = vsub.f32 %v4503_v17, %v450_v58  ;;  %482 = vadd.xlane.f32.xlu0 %v481_v43  ;;  %v852_v31 = vsel %vm426_vm1, %v4665_v35, 0.0 }
 0x1b3   : > { %4057 = vpow2.f32 %v461_v24  ;;  %v447_v39 = vpop.xlane.xlu0 %446 }
 0x1b4   : > { %v4668_v4 = vpop.eup %4049  ;;  %v457_v54 = vsub.f32 %v4489_v60, %v447_v39  ;;  %4059 = vpow2.f32 %v832_v2  ;;  %v473_v49 = vmul.f32 1.442695, %v458_v25 }
 0x1b5   : > { %v444_v50 = vpop.xlane.xlu1 %443  ;;  %v484_v27 = vsel %vm426_vm1, %v4668_v4, 0.0  ;;  %v4675_v33 = vpop.eup %4051 }
 0x1b6   : > { %v471_v34 = vmul.f32 1.442695, %v457_v54  ;;  %v456_v17 = vsub.f32 %v4509_v29, %v444_v50  ;;  %485 = vadd.xlane.f32.xlu1 %v484_v27  ;;  %853 = vadd.xlane.f32.xlu0 %v852_v31  ;;  %v475_v46 = vsel %vm426_vm1, %v4675_v33, 0.0 }
 0x1b7   : > { %v441_v36 = vpop.xlane.xlu0 %440 }
 0x1b8   : > { %v4678_v38 = vpop.eup %4053  ;;  %4061 = vpow2.f32 %v471_v34  ;;  %v455_v60 = vsub.f32 %v4497_v5, %v441_v36  ;;  %v469_v40 = vmul.f32 1.442695, %v456_v17 }
 0x1b9   : > { %4063 = vpow2.f32 %v473_v49  ;;  %v815_v42 = vpop.xlane.xlu1 %814  ;;  %v855_v45 = vsel %vm426_vm1, %v4678_v38, 0.0  ;;  %v4685_v47 = vpop.eup %4055 }
 0x1ba   : > { %v467_v29 = vmul.f32 1.442695, %v455_v60  ;;  %v827_v55 = vsub.f32 %v4513_v37, %v815_v42  ;;  %856 = vadd.xlane.f32.xlu1 %v855_v45  ;;  %476 = vadd.xlane.f32.xlu0 %v475_v46  ;;  %v846_v26 = vsel %vm426_vm1, %v4685_v47, 0.0 }
 0x1bb   : > { %v812_v48 = vpop.xlane.xlu0 %811 }
 0x1bc   : > { %4065 = vpow2.f32 %v467_v29  ;;  %v826_v5 = vsub.f32 %v4500_v12, %v812_v48  ;;  %v840_v11 = vmul.f32 1.442695, %v827_v55 }
 0x1bd   : > { %4067 = vpow2.f32 %v469_v40 }
 0x1be   : > { %v838_v52 = vmul.f32 1.442695, %v826_v5  ;;  %847 = vadd.xlane.f32.xlu0 %v846_v26 }
 0x1c0   : > { %v4691_v56 = vpop.eup %4057  ;;  %4069 = vpow2.f32 %v838_v52 }
 0x1c1   : > { %4071 = vpow2.f32 %v840_v11  ;;  %v478_v37 = vsel %vm426_vm1, %v4691_v56, 0.0  ;;  %v4695_v44 = vpop.eup %4059 }
 0x1c2   : > { %479 = vadd.xlane.f32.xlu1 %v478_v37  ;;  %v849_v12 = vsel %vm426_vm1, %v4695_v44, 0.0 }
 0x1c5   : > { %v4697_v53 = vpop.eup %4061 }
 0x1c6   : > { %v4701_v57 = vpop.eup %4063  ;;  %850 = vadd.xlane.f32.xlu1 %v849_v12  ;;  %v493_v7 = vsel %vm426_vm1, %v4697_v53, 0.0 }
 0x1c7   : > { %494 = vadd.xlane.f32.xlu0 %v493_v7  ;;  %v496_v63 = vsel %vm426_vm1, %v4701_v57, 0.0 }
 0x1c9   : > { %v4705_v62 = vpop.eup %4065 }
 0x1ca   : > { %v4709_v61 = vpop.eup %4067  ;;  %497 = vadd.xlane.f32.xlu1 %v496_v63  ;;  %v487_v1 = vsel %vm426_vm1, %v4705_v62, 0.0 }
 0x1cb   : > { %488 = vadd.xlane.f32.xlu0 %v487_v1  ;;  %v490_v20 = vsel %vm426_vm1, %v4709_v61, 0.0 }
 0x1cd   : > { %v4713_v51 = vpop.eup %4069 }
 0x1ce   : > { %v4717_v6 = vpop.eup %4071  ;;  %491 = vadd.xlane.f32.xlu1 %v490_v20  ;;  %v858_v3 = vsel %vm426_vm1, %v4713_v51, 0.0 }
 0x1cf   : > { %859 = vadd.xlane.f32.xlu0 %v858_v3  ;;  %v861_v15 = vsel %vm426_vm1, %v4717_v6, 0.0 }
 0x1d0   : > { %v821_v8 = vpop.xlane.xlu1 %820  ;;  %v818_v9 = vpop.xlane.xlu0 %817 }
 0x1d1   : > { %v829_v13 = vsub.f32 %v4506_v22, %v821_v8  ;;  %v828_v14 = vsub.f32 %v4494_v0, %v818_v9 }
 0x1d2   : > { %862 = vadd.xlane.f32.xlu1 %v861_v15 }
 0x1d3   : > { %v844_v59 = vmul.f32 1.442695, %v829_v13  ;;  %v842_v10 = vmul.f32 1.442695, %v828_v14 }
 0x1d5   : > { %4073 = vpow2.f32 %v844_v59 }
 0x1d6   : > { %4075 = vpow2.f32 %v842_v10 }
 0x1e2   : > { %v4725_v16 = vpop.eup %4073 }
 0x1e3   : > { %v4727_v28 = vpop.eup %4075  ;;  %v867_v30 = vsel %vm426_vm1, %v4725_v16, 0.0 }
 0x1e4   : > { %v864_v22 = vsel %vm426_vm1, %v4727_v28, 0.0  ;;  %868 = vadd.xlane.f32.xlu1 %v867_v30 }
 0x1e5   : > { %865 = vadd.xlane.f32.xlu0 %v864_v22 }
 0x23b   : > { %v483_v0 = vpop.xlane.xlu0 %482 }
 0x23c   : > { %4077 = vrcp.f32 %v483_v0 }
 0x23f   : > { %v486_v18 = vpop.xlane.xlu1 %485  ;;  %v854_v19 = vpop.xlane.xlu0 %853 }
 0x240   : > { %4079 = vrcp.f32 %v486_v18 }
 0x241   : > { %4081 = vrcp.f32 %v854_v19 }
 0x243   : > { %v857_v41 = vpop.xlane.xlu1 %856  ;;  %v477_v21 = vpop.xlane.xlu0 %476 }
 0x244   : > { %4083 = vrcp.f32 %v857_v41 }
 0x245   : > { %4085 = vrcp.f32 %v477_v21 }
 0x247   : > { %v848_v32 = vpop.xlane.xlu0 %847 }
 0x248   : > { %4087 = vrcp.f32 %v848_v32 }
 0x249   : > { %v4078_v2 = vpop.eup %4077 }
 0x24a   : > { %v509_v24 = vmul.f32 %v4078_v2, %v4661_v23 }
 0x24b   : > { %v480_v58 = vpop.xlane.xlu1 %479 }
 0x24c   : > { %v661_v43 = vpack.c.bf16 %v509_v24, %v509_v24  ;;  %4089 = vrcp.f32 %v480_v58 }
 0x24d   : > { %v4080_v25 = vpop.eup %4079 }
 0x24e   : > { %v4082_v39 = vpop.eup %4081  ;;  %670 = vst.msk [vmem:[#allocation2 + $0x8] sm:$0xf] %vm667_vm2, %v661_v43  ;;  %v510_v54 = vmul.f32 %v4080_v25, %v4668_v4 }
 0x24f   : > { %v880_v49 = vmul.f32 %v4082_v39, %v4665_v35  ;;  %v851_v50 = vpop.xlane.xlu1 %850 }
 0x250   : > { %v662_v27 = vpack.c.bf16 %v510_v54, %v510_v54  ;;  %4091 = vrcp.f32 %v851_v50  ;;  %v495_v31 = vpop.xlane.xlu0 %494 }
 0x251   : > { %v4084_v34 = vpop.eup %4083  ;;  %v1032_v17 = vpack.c.bf16 %v880_v49, %v880_v49  ;;  %4093 = vrcp.f32 %v495_v31 }
 0x252   : > { %v4086_v36 = vpop.eup %4085  ;;  %671 = vst.msk [vmem:[#allocation2 + $0xc] sm:$0xf] %vm667_vm2, %v662_v27  ;;  %v881_v23 = vmul.f32 %v4084_v34, %v4678_v38 }
 0x253   : > { %1041 = vst.msk [vmem:[#allocation2 + $0x28] sm:$0xf] %vm667_vm2, %v1032_v17  ;;  %v507_v60 = vmul.f32 %v4086_v36, %v4675_v33  ;;  %v498_v40 = vpop.xlane.xlu1 %497 }
 0x254   : > { %v1033_v4 = vpack.c.bf16 %v881_v23, %v881_v23  ;;  %4095 = vrcp.f32 %v498_v40  ;;  %v489_v35 = vpop.xlane.xlu0 %488 }
 0x255   : > { %v4088_v42 = vpop.eup %4087  ;;  %v659_v45 = vpack.c.bf16 %v507_v60, %v507_v60  ;;  %4097 = vrcp.f32 %v489_v35 }
 0x256   : > { %1042 = vst.msk [vmem:[#allocation2 + $0x2c] sm:$0xf] %vm667_vm2, %v1033_v4  ;;  %v878_v46 = vmul.f32 %v4088_v42, %v4685_v47 }
 0x257   : > { %668 = vst.msk [vmem:[#allocation2] sm:$0xf] %vm667_vm2, %v659_v45  ;;  %v492_v29 = vpop.xlane.xlu1 %491 }
 0x258   : > { %v1030_v55 = vpack.c.bf16 %v878_v46, %v878_v46  ;;  %4099 = vrcp.f32 %v492_v29  ;;  %v860_v38 = vpop.xlane.xlu0 %859 }
 0x259   : > { %v4090_v48 = vpop.eup %4089  ;;  %4101 = vrcp.f32 %v860_v38 }
 0x25a   : > { %v508_v33 = vmul.f32 %v4090_v48, %v4691_v56  ;;  %1039 = vst.msk [vmem:[#allocation2 + $0x20] sm:$0xf] %vm667_vm2, %v1030_v55 }
 0x25b   : > { %v863_v5 = vpop.xlane.xlu1 %862 }
 0x25c   : > { %v660_v11 = vpack.c.bf16 %v508_v33, %v508_v33  ;;  %4103 = vrcp.f32 %v863_v5 }
 0x25d   : > { %v4092_v26 = vpop.eup %4091 }
 0x25e   : > { %v4094_v52 = vpop.eup %4093  ;;  %669 = vst.msk [vmem:[#allocation2 + $0x4] sm:$0xf] %vm667_vm2, %v660_v11  ;;  %v879_v47 = vmul.f32 %v4092_v26, %v4695_v44 }
 0x25f   : > { %v513_v37 = vmul.f32 %v4094_v52, %v4697_v53 }
 0x260   : > { %v1031_v12 = vpack.c.bf16 %v879_v47, %v879_v47 }
 0x261   : > { %v4096_v7 = vpop.eup %4095  ;;  %v665_v63 = vpack.c.bf16 %v513_v37, %v513_v37 }
 0x262   : > { %v4098_v1 = vpop.eup %4097  ;;  %1040 = vst.msk [vmem:[#allocation2 + $0x24] sm:$0xf] %vm667_vm2, %v1031_v12  ;;  %v514_v56 = vmul.f32 %v4096_v7, %v4701_v57 }
 0x263   : > { %674 = vst.msk [vmem:[#allocation2 + $0x18] sm:$0xf] %vm667_vm2, %v665_v63  ;;  %v511_v20 = vmul.f32 %v4098_v1, %v4705_v62 }
 0x264   : > { %v666_v3 = vpack.c.bf16 %v514_v56, %v514_v56 }
 0x265   : > { %v4100_v8 = vpop.eup %4099  ;;  %v663_v9 = vpack.c.bf16 %v511_v20, %v511_v20 }
 0x266   : > { %v4102_v13 = vpop.eup %4101  ;;  %675 = vst.msk [vmem:[#allocation2 + $0x1c] sm:$0xf] %vm667_vm2, %v666_v3  ;;  %v512_v44 = vmul.f32 %v4100_v8, %v4709_v61 }
 0x267   : > { %672 = vst.msk [vmem:[#allocation2 + $0x10] sm:$0xf] %vm667_vm2, %v663_v9  ;;  %v882_v53 = vmul.f32 %v4102_v13, %v4713_v51 }
 0x268   : > { %v664_v14 = vpack.c.bf16 %v512_v44, %v512_v44 }
 0x269   : > { %v4104_v15 = vpop.eup %4103  ;;  %v1034_v59 = vpack.c.bf16 %v882_v53, %v882_v53 }
 0x26a   : > { %673 = vst.msk [vmem:[#allocation2 + $0x14] sm:$0xf] %vm667_vm2, %v664_v14  ;;  %v883_v57 = vmul.f32 %v4104_v15, %v4717_v6 }
 0x26b   : > { %1043 = vst.msk [vmem:[#allocation2 + $0x30] sm:$0xf] %vm667_vm2, %v1034_v59 }
 0x26c   : > { %v1035_v62 = vpack.c.bf16 %v883_v57, %v883_v57 }
 0x26d   : > { %v869_v10 = vpop.xlane.xlu1 %868 }
 0x26e   : > { %1044 = vst.msk [vmem:[#allocation2 + $0x34] sm:$0xf] %vm667_vm2, %v1035_v62  ;;  %v866_v30 = vpop.xlane.xlu0 %865  ;;  %4105 = vrcp.f32 %v869_v10 }
 0x26f   : > { %4107 = vrcp.f32 %v866_v30 }
 0x27b   : > { %v4106_v61 = vpop.eup %4105 }
 0x27c   : > { %v4108_v22 = vpop.eup %4107  ;;  %v885_v51 = vmul.f32 %v4106_v61, %v4725_v16 }
 0x27d   : > { %v884_v0 = vmul.f32 %v4108_v22, %v4727_v28 }
 0x27e   : > { %v1037_v18 = vpack.c.bf16 %v885_v51, %v885_v51 }
 0x27f   : > { %v1036_v19 = vpack.c.bf16 %v884_v0, %v884_v0 }
 0x280   : > { %1046 = vst.msk [vmem:[#allocation2 + $0x3c] sm:$0xf] %vm667_vm2, %v1037_v18 }
 0x281   : > { %1045 = vst.msk [vmem:[#allocation2 + $0x38] sm:$0xf] %vm667_vm2, %v1036_v19 }
 0x282 PF: > { %v4109_v6 = vld [vmem:[%s5069_s4 + $0x8] sm:$0xff]   ;;  %v4110_v16 = vld [vmem:[%s5069_s4] sm:$0xff]   ;;  %vm1101_vm3 = vcmask 261120   ;;  %v1068_v32 = vld [vmem:[%s4426_s17 + $0x10] sm:$0xff]  ;;  %vm1219_vm4 = vcmask 64512   ;;  %vm1226_vm5 = vcmask 1043456  }
 0x283   : > { %3635 = vmatprep.subr.bf16.mxu0 %v4109_v6  ;;  %v1066_v28 = vld [vmem:[%s4426_s17] sm:$0xff]  ;;  %v1067_v41 = vld [vmem:[%s4426_s17 + $0x8] sm:$0xff]  ;;  %v1069_v2 = vld [vmem:[%s4426_s17 + $0x18] sm:$0xff]  ;;  %vm4258_vm6 = vmmov 0   ;;  %s3283_s13 = sshll.u32 %s4432_s0, 4  ;;  %s4259_s28 = smov [#allocation9]   ;;  %s5015_s13 = int_to_ptr.vmem [resolvable:$true] %s3283_s13 }
 0x284   : > { %3636 = vmatpush3.bf16.msra.mxu0 %v4109_v6  ;;  %v1074_v21 = vpack.c.bf16 %v1067_v41, %v1066_v28  ;;  %v1070_v24 = vld [vmem:[%s4426_s17 + $0x20] sm:$0xff]  ;;  %v1071_v58 = vld [vmem:[%s4426_s17 + $0x28] sm:$0xff]  ;;  %v1075_v39 = vpack.c.bf16 %v1069_v2, %v1068_v32  ;;  %v1191_v49 = vld [vmem:[#allocation3 + $0x10] sm:$0xf]  ;;  %v4257_v32 = vmov 0.0   ;;  %s4167_s30 = scalar_lea.vmem %s5015_s13, 2048 }
 0x285   : > { %3637 = vmatprep.subr.bf16.mxu0 %v4110_v16  ;;  %v1189_v43 = vld [vmem:[#allocation3 + $0x8] sm:$0xf]  ;;  %v1187_v25 = vld [vmem:[#allocation3] sm:$0xf]  ;;  %v1076_v54 = vpack.c.bf16 %v1071_v58, %v1070_v24  ;;  %v1188_v50 = vld [vmem:[#allocation3 + $0x4] sm:$0xf]  ;;  %p4168_p1 = scmp.ne.s32.totalorder %s5015_s13, %s4167_s30 }
 0x286   : > { %3639 = vmatprep.mubr.msk.bf16.mxu0 %vm1101_vm3, %v1074_v21  ;;  %1353 = vxpose.xlu1.c.b16.start.end [1/1] (short) (narrow) %v1189_v43, 32  ;;  %v1072_v27 = vld [vmem:[%s4426_s17 + $0x30] sm:$0xff]  ;;  %v1073_v31 = vld [vmem:[%s4426_s17 + $0x38] sm:$0xff]  ;;  %v1190_v34 = vld [vmem:[#allocation3 + $0xc] sm:$0xf]  ;;  %s4171_s19 = sshll.u32 %s4259_s28, 4  ;;  %s4172_s19 = int_to_ptr.vmem [resolvable:$false] %s4171_s19 }
 0x287   : > { %1203 = vxpose.xlu0.c.b16.start.end [1/1] (short) (narrow) %v1187_v25, 32  ;;  %v1193_v17 = vld [vmem:[#allocation3 + $0x18] sm:$0xf]  ;;  %v1077_v36 = vpack.c.bf16 %v1073_v31, %v1072_v27  ;;  %v1192_v23 = vld [vmem:[#allocation3 + $0x14] sm:$0xf]  ;;  %p4169_p12 = pnand %p4168_p1, %p4387_p13  ;;  %s4173_s14 = scalar_lea.vmem %s4172_s19, 4096 }
 0x288   : > { %3638 = vmatpush3.bf16.msra.mxu0 %v4110_v16  ;;  %v1194_v45 = vld [vmem:[#allocation3 + $0x1c] sm:$0xf]  ;;  %v4796_v5 = vld [vmem:[%s5070_s5] ss:$0 sm:$0xff]  ;;  %v2291_v43 = vld [vmem:[#allocation3 + $0x24] sm:$0xf]  ;;  %p4174_p2 = scmp.lt.s32.totalorder %s5015_s13, %s4172_s19  ;;  %p4175_p3 = scmp.lt.s32.totalorder %s4173_s14, %s4167_s30 }
 0x289   : > { %v2290_v58 = vld [vmem:[#allocation3 + $0x20] sm:$0xf]  ;;  %v2292_v25 = vld [vmem:[#allocation3 + $0x28] sm:$0xf]  ;;  %v2297_v27 = vld [vmem:[#allocation3 + $0x3c] sm:$0xf]  ;;  %p4170_p0 = pneg %p4169_p12 }
 0x28a   : > { %p4176_p5 = por %p4175_p3, %p4174_p2 }
 0x28b   : > { %3640 = vmatmul.mubr.msk.bf16.vlgmr.msra.gmra.mxu0 %vm1101_vm3, %v1075_v39  ;;  %1501 = vxpose.xlu1.c.b16.start.end [1/1] (short) (narrow) %v1191_v49, 32  ;;  %v2293_v39 = vld [vmem:[#allocation3 + $0x2c] sm:$0xf]  ;;  %v2295_v49 = vld [vmem:[#allocation3 + $0x34] sm:$0xf] }
 0x28c   : > { %3643 = vmatprep.mubr.msk.bf16.mxu0 %vm1101_vm3, %v1076_v54  ;;  %1279 = vxpose.xlu0.c.b16.start.end [1/1] (short) (narrow) %v1188_v50, 32  ;;  %v2294_v54 = vld [vmem:[#allocation3 + $0x30] sm:$0xf]  ;;  %v2296_v50 = vld [vmem:[#allocation3 + $0x38] sm:$0xf]  ;;  %p4177_p7 = pnand %p4176_p5, %p4170_p0 }
 0x290   : > { %1427 = vxpose.xlu1.c.b16.start.end [1/1] (short) (narrow) %v1190_v34, 32 }
 0x291   : > { %1649 = vxpose.xlu0.c.b16.start.end [1/1] (short) (narrow) %v1193_v17, 32 }
 0x293   : > { %3644 = vmatmul.mubr.msk.bf16.gmra.mxu0 %vm1101_vm3, %v1077_v36 }
 0x295   : > { %1723 = vxpose.xlu1.c.b16.start.end [1/1] (short) (narrow) %v1194_v45, 32 }
 0x296   : > { %1575 = vxpose.xlu0.c.b16.start.end [1/1] (short) (narrow) %v1192_v23, 32 }
 0x29a   : > { %2380 = vxpose.xlu1.c.b16.start.end [1/1] (short) (narrow) %v2291_v43, 32 }
 0x29b   : > { %2306 = vxpose.xlu0.c.b16.start.end [1/1] (short) (narrow) %v2290_v58, 32 }
 0x29f   : > { %2528 = vxpose.xlu1.c.b16.start.end [1/1] (short) (narrow) %v2293_v39, 32 }
 0x2a0   : > { %2454 = vxpose.xlu0.c.b16.start.end [1/1] (short) (narrow) %v2292_v25, 32 }
 0x2a4   : > { %2676 = vxpose.xlu1.c.b16.start.end [1/1] (short) (narrow) %v2295_v49, 32 }
 0x2a5   : > { %2602 = vxpose.xlu0.c.b16.start.end [1/1] (short) (narrow) %v2294_v54, 32 }
 0x2a9   : > { %2824 = vxpose.xlu1.c.b16.start.end [1/1] (short) (narrow) %v2297_v27, 32 }
 0x2aa   : > { %2750 = vxpose.xlu0.c.b16.start.end [1/1] (short) (narrow) %v2296_v50, 32  ;;  %v1182_v50 = vld [vmem:[#allocation2 + $0xc] sm:$0xf] }
 0x2e8   : > { %v1361_v60 = vpop.trf.xlu1 }
 0x2e9   : > { %v1211_v40 = vpop.trf.xlu0 }
 0x2ea   : > { %3649 = vmatprep.mubr.msk.bf16.mxu1 %vm1219_vm4, %v1211_v40 }
 0x2ec   : > { %v4784_v4 = vpop.trf.xlu1 }
 0x2ed   : > { %v1212_v29 = vpop.trf.xlu0 }
 0x2f0   : > { %v4786_v35 = vpop.trf.xlu1 }
 0x2f1   : > { %v1287_v55 = vpop.trf.xlu0 }
 0x2f4   : > { %v4788_v42 = vpop.trf.xlu1 }
 0x2f5   : > { %v1288_v38 = vpop.trf.xlu0 }
 0x2f8   : > { %v1435_v46 = vpop.trf.xlu1 }
 0x2f9   : > { %3667 = vmatprep.mubr.msk.bf16.mxu0 %vm1219_vm4, %v1435_v46  ;;  %v4791_v33 = vpop.trf.xlu0 }
 0x2fc   : > { %v1436_v44 = vpop.trf.xlu1 }
 0x2fd   : > { %v1658_v20 = vpop.trf.xlu0 }
 0x300   : > { %v1731_v2 = vpop.trf.xlu1 }
 0x301   : > { %v1583_v57 = vpop.trf.xlu0 }
 0x304   : > { %v1732_v24 = vpop.trf.xlu1 }
 0x305   : > { %v1584_v6 = vpop.trf.xlu0 }
 0x34b   : > { %v3641_v48 = vpop.f32.mrf.mxu0 }
 0x34c   : > { %v1157_v7 = vadd.f32 %v3641_v48, %v4796_v5 }
 0x34d   : > { %v1148_v11 = vpop.f32.mrf.mxu0 }
 0x34e   : > { %v1149_v26 = vadd.f32 %v4796_v5, %v1148_v11  ;;  %v1197_v53 = vpack.c.bf16 %v1157_v7, %v1157_v7 }
 0x34f   : > { %v3642_v52 = vpop.f32.mrf.mxu0 }
 0x350   : > { %v1195_v47 = vpack.c.bf16 %v1149_v26, %v1149_v26  ;;  %v1160_v37 = vadd.f32 %v3642_v52, %v4796_v5  ;;  %v1376_v0 = vsel %vm1226_vm5, %v1197_v53, 0 }
 0x351   : > { %v1151_v12 = vpop.f32.mrf.mxu0 }
 0x352   : > { %v1198_v63 = vpack.c.bf16 %v1160_v37, %v1160_v37  ;;  %v1152_v1 = vadd.f32 %v4796_v5, %v1151_v12  ;;  %3883 = vmatprep.subr.msk.bf16.mxu1 %vm1226_vm5, %v1195_v47  ;;  %v1228_v56 = vsel %vm1226_vm5, %v1195_v47, 0  ;;  %v1181_v37 = vld [vmem:[#allocation2 + $0x8] sm:$0xf] }
 0x353   : > { %3648 = vmatpush3.bf16.msra.mxu1 %v1228_v56  ;;  %v3645_v3 = vpop.f32.mrf.mxu0 }
 0x354   : > { %v1450_v8 = vsel %vm1226_vm5, %v1198_v63, 0  ;;  %v1196_v9 = vpack.c.bf16 %v1152_v1, %v1152_v1  ;;  %3886 = vmatprep.subr.msk.bf16.mxu0 %vm1226_vm5, %v1198_v63  ;;  %v1173_v19 = vadd.f32 %v3645_v3, %v4796_v5  ;;  %v1183_v3 = vld [vmem:[#allocation2 + $0x10] sm:$0xf] }
 0x355   : > { %3666 = vmatpush3.bf16.msra.mxu0 %v1450_v8  ;;  %v1164_v13 = vpop.f32.mrf.mxu0 }
 0x356   : > { %v1302_v14 = vsel %vm1226_vm5, %v1196_v9, 0  ;;  %3650 = vmatmul.mubr.msk.bf16.vlgmr.msra.gmra.mxu1 %vm1219_vm4, %v1212_v29  ;;  %3884 = vmatprep.subr.msk.bf16.mxu1 %vm1226_vm5, %v1196_v9  ;;  %v1165_v59 = vadd.f32 %v4796_v5, %v1164_v13  ;;  %v1201_v28 = vpack.c.bf16 %v1173_v19, %v1173_v19  ;;  %v3450_v19 = vld [vmem:[%s4426_s17 + $0x78] sm:$0xff] }
 0x357   : > { %3654 = vmatpush3.bf16.msra.mxu1 %v1302_v14  ;;  %3655 = vmatprep.mubr.msk.bf16.mxu1 %vm1219_vm4, %v1287_v55  ;;  %v3646_v15 = vpop.f32.mrf.mxu0  ;;  %v3444_v14 = vld [vmem:[%s4426_s17 + $0x48] sm:$0xff] }
 0x358   : > { %3885 = vmatprep.subr.msk.bf16.mxu1 %vm1226_vm5, %v1197_v53  ;;  %3668 = vmatmul.mubr.msk.bf16.vlgmr.msra.gmra.mxu0 %vm1219_vm4, %v1436_v44  ;;  %v1176_v62 = vadd.f32 %v3646_v15, %v4796_v5  ;;  %v1199_v61 = vpack.c.bf16 %v1165_v59, %v1165_v59  ;;  %v1672_v21 = vsel %vm1226_vm5, %v1201_v28, 0  ;;  %v4111_v44 = vld [vmem:[%s5069_s4 + $0x8] sm:$0xff]   ;;  %v3443_v53 = vld [vmem:[%s4426_s17 + $0x40] sm:$0xff]  ;;  %v1185_v59 = vld [vmem:[#allocation2 + $0x18] sm:$0xf] }
 0x359   : > { %v1167_v10 = vpop.f32.mrf.mxu0  ;;  %3679 = vmatprep.mubr.msk.bf16.mxu0 %vm1219_vm4, %v1583_v57  ;;  %v2176_v57 = vpack.c.bf16 %v3444_v14, %v3443_v53 }
 0x35a   : > { %v1168_v30 = vadd.f32 %v4796_v5, %v1167_v10  ;;  %v1202_v51 = vpack.c.bf16 %v1176_v62, %v1176_v62  ;;  %v1524_v41 = vsel %vm1226_vm5, %v1199_v61, 0  ;;  %v4112_v62 = vld [vmem:[%s5069_s4] sm:$0xff]   ;;  %v3445_v10 = vld [vmem:[%s4426_s17 + $0x50] sm:$0xff] }
 0x35c   : > { %v1200_v22 = vpack.c.bf16 %v1168_v30, %v1168_v30  ;;  %v1746_v16 = vsel %vm1226_vm5, %v1202_v51, 0  ;;  %v3446_v30 = vld [vmem:[%s4426_s17 + $0x58] sm:$0xff] }
 0x35e   : > { %3656 = vmatmul.mubr.msk.bf16.vlgmr.msra.gmra.mxu1 %vm1219_vm4, %v1288_v38  ;;  %v1598_v18 = vsel %vm1226_vm5, %v1200_v22, 0  ;;  %3888 = vmatprep.subr.msk.bf16.mxu0 %vm1226_vm5, %v1200_v22  ;;  %v3448_v22 = vld [vmem:[%s4426_s17 + $0x68] sm:$0xff] }
 0x35f   : > { %3660 = vmatpush3.bf16.msra.mxu1 %v1376_v0  ;;  %3661 = vmatprep.mubr.msk.bf16.mxu1 %vm1219_vm4, %v1361_v60 }
 0x360   : > { %3678 = vmatpush3.bf16.msra.mxu0 %v1598_v18  ;;  %3887 = vmatprep.subr.msk.bf16.mxu1 %vm1226_vm5, %v1199_v61  ;;  %v3447_v61 = vld [vmem:[%s4426_s17 + $0x60] sm:$0xff]  ;;  %v3449_v18 = vld [vmem:[%s4426_s17 + $0x70] sm:$0xff]  ;;  %s3496_s17 = sshll.u32 %s4243_s24, 11  ;;  %s3268_s24 = scalar_lea.sflag [#allocation6], %s4422_s25 }
 0x361   : > { %3890 = vmatprep.subr.msk.bf16.mxu0 %vm1226_vm5, %v1202_v51  ;;  %v2177_v51 = vpack.c.bf16 %v3446_v30, %v3445_v10  ;;  %v2178_v0 = vpack.c.bf16 %v3448_v22, %v3447_v61  ;;  %s5013_s18 = scalar_lea.hbm %s5071_s6, %s3496_s17 }
 0x363   : > { %3680 = vmatmul.mubr.msk.bf16.vlgmr.msra.gmra.mxu0 %vm1219_vm4, %v1584_v6  ;;  %v2179_v6 = vpack.c.bf16 %v3450_v19, %v3449_v18 }
 0x364   : > { %3690 = vmatpush3.bf16.msra.mxu0 %v1746_v16  ;;  %3691 = vmatprep.mubr.msk.bf16.mxu0 %vm1219_vm4, %v1731_v2 }
 0x365   : > { %3703 = vmatprep.subr.bf16.mxu0 %v4257_v32 }
 0x366   : > { %3662 = vmatmul.mubr.msk.bf16.vlgmr.msra.gmra.mxu1 %vm1219_vm4, %v4784_v4 }
 0x367   : > { %3672 = vmatpush3.bf16.msra.mxu1 %v1524_v41  ;;  %3673 = vmatprep.mubr.msk.bf16.mxu1 %vm1219_vm4, %v4786_v35  ;;  %v1179_v35 = vld [vmem:[#allocation2] sm:$0xf] }
 0x368   : > { %3889 = vmatprep.subr.msk.bf16.mxu1 %vm1226_vm5, %v1201_v28  ;;  %v1180_v28 = vld [vmem:[#allocation2 + $0x4] sm:$0xf] }
 0x36b   : > { %3692 = vmatmul.mubr.msk.bf16.vlgmr.msra.gmra.mxu0 %vm1219_vm4, %v1732_v24 }
 0x36c   : > { %3707 = vmatprep.mubr.msk.bf16.mxu0 %vm4258_vm6, %v4257_v32 }
 0x36e   : > { %3674 = vmatmul.mubr.msk.bf16.vlgmr.msra.gmra.mxu1 %vm1219_vm4, %v4788_v42 }
 0x36f   : > { %3684 = vmatpush3.bf16.msra.mxu1 %v1672_v21  ;;  %3685 = vmatprep.mubr.msk.bf16.mxu1 %vm1219_vm4, %v4791_v33 }
 0x370   : > { %3695 = vmatprep.subr.bf16.mxu1 %v4257_v32 }
 0x376   : > { %3686 = vmatmul.mubr.msk.bf16.vlgmr.msra.gmra.mxu1 %vm1219_vm4, %v1658_v20 }
 0x377   : > { %3699 = vmatprep.mubr.msk.bf16.mxu1 %vm4258_vm6, %v4257_v32 }
 0x416   : > { %v3651_v31 = vpop.f32.mrf.mxu1 }
 0x418   : > { %v1264_v34 = vpop.f32.mrf.mxu1  ;;  %v3669_v16 = vpop.f32.mrf.mxu0 }
 0x41a   : > { %v3652_v17 = vpop.f32.mrf.mxu1  ;;  %v1486_v41 = vpop.f32.mrf.mxu0 }
 0x41b   : > { %v1798_v36 = vpack.c.bf16 %v3652_v17, %v3651_v31 }
 0x41c   : > { %v1267_v23 = vpop.f32.mrf.mxu1  ;;  %v3670_v21 = vpop.f32.mrf.mxu0 }
 0x41d   : > { %3696 = vmatpush3.bf16.msra.mxu1 %v1798_v36  ;;  %v1797_v40 = vpack.c.bf16 %v1267_v23, %v1264_v34  ;;  %v1804_v2 = vpack.c.bf16 %v3670_v21, %v3669_v16  ;;  %v1184_v23 = vld [vmem:[#allocation2 + $0x14] sm:$0xf] }
 0x41e   : > { %v3657_v60 = vpop.f32.mrf.mxu1  ;;  %3697 = vmatprep.subr.bf16.mxu1 %v4257_v32  ;;  %v1489_v24 = vpop.f32.mrf.mxu0 }
 0x41f   : > { %v1803_v58 = vpack.c.bf16 %v1489_v24, %v1486_v41 }
 0x420   : > { %v1338_v4 = vpop.f32.mrf.mxu1 }
 0x421   : > { %3698 = vmatpush3.bf16.msra.mxu1 %v1797_v40 }
 0x422   : > { %v3658_v42 = vpop.f32.mrf.mxu1  ;;  %3711 = vmatprep.subr.bf16.mxu1 %v4257_v32 }
 0x423   : > { %v1800_v45 = vpack.c.bf16 %v3658_v42, %v3657_v60  ;;  %v3681_v43 = vpop.f32.mrf.mxu0 }
 0x424   : > { %v1341_v46 = vpop.f32.mrf.mxu1  ;;  %3700 = vmatmul.mubr.msk.bf16.vlgmr.msra.gmra.mxu1 %vm1101_vm3, %v1179_v35  ;;  %v2314_v35 = vpop.trf.xlu0 }
 0x425   : > { %3704 = vmatpush3.bf16.msra.mxu0 %v1800_v45  ;;  %3715 = vmatprep.mubr.msk.bf16.mxu1 %vm4258_vm6, %v4257_v32  ;;  %v1799_v55 = vpack.c.bf16 %v1341_v46, %v1338_v4  ;;  %v1634_v25 = vpop.f32.mrf.mxu0  ;;  %v1186_v4 = vld [vmem:[#allocation2 + $0x1c] sm:$0xf] }
 0x426   : > { %v3663_v29 = vpop.f32.mrf.mxu1  ;;  %3705 = vmatprep.subr.bf16.mxu0 %v4257_v32 }
 0x427   : > { %v3682_v39 = vpop.f32.mrf.mxu0 }
 0x428   : > { %v1412_v38 = vpop.f32.mrf.mxu1  ;;  %v1808_v54 = vpack.c.bf16 %v3682_v39, %v3681_v43  ;;  %v2315_v42 = vpop.trf.xlu0 }
 0x429   : > { %3706 = vmatpush3.bf16.msra.mxu0 %v1799_v55  ;;  %v1637_v49 = vpop.f32.mrf.mxu0 }
 0x42a   : > { %v3664_v48 = vpop.f32.mrf.mxu1  ;;  %3719 = vmatprep.subr.bf16.mxu0 %v4257_v32  ;;  %v1807_v27 = vpack.c.bf16 %v1637_v49, %v1634_v25 }
 0x42b   : > { %v1802_v33 = vpack.c.bf16 %v3664_v48, %v3663_v29  ;;  %v3693_v31 = vpop.f32.mrf.mxu0 }
 0x42c   : > { %v1415_v11 = vpop.f32.mrf.mxu1  ;;  %3708 = vmatmul.mubr.msk.bf16.vlgmr.msra.gmra.mxu0 %vm1101_vm3, %v1180_v28  ;;  %v2462_v45 = vpop.trf.xlu0 }
 0x42d   : > { %3712 = vmatpush3.bf16.msra.mxu1 %v1802_v33  ;;  %v1801_v52 = vpack.c.bf16 %v1415_v11, %v1412_v38  ;;  %3723 = vmatprep.mubr.msk.bf16.mxu0 %vm4258_vm6, %v4257_v32  ;;  %v1782_v34 = vpop.f32.mrf.mxu0 }
 0x42e   : > { %v3675_v26 = vpop.f32.mrf.mxu1  ;;  %3713 = vmatprep.subr.bf16.mxu1 %v4257_v32  ;;  %3720 = vmatpush3.bf16.msra.mxu0 %v1804_v2 }
 0x42f   : > { %3721 = vmatprep.subr.bf16.mxu0 %v4257_v32  ;;  %v3694_v17 = vpop.f32.mrf.mxu0 }
 0x430   : > { %v1560_v47 = vpop.f32.mrf.mxu1  ;;  %v1812_v36 = vpack.c.bf16 %v3694_v17, %v3693_v31 }
 0x431   : > { %3714 = vmatpush3.bf16.msra.mxu1 %v1801_v52  ;;  %v1785_v60 = vpop.f32.mrf.mxu0 }
 0x432   : > { %v3676_v12 = vpop.f32.mrf.mxu1  ;;  %3727 = vmatprep.subr.bf16.mxu1 %v4257_v32  ;;  %3722 = vmatpush3.bf16.msra.mxu0 %v1803_v58  ;;  %v1811_v40 = vpack.c.bf16 %v1785_v60, %v1782_v34 }
 0x433   : > { %v1806_v7 = vpack.c.bf16 %v3676_v12, %v3675_v26  ;;  %3735 = vmatprep.subr.bf16.mxu0 %v4257_v32 }
 0x434   : > { %v1563_v63 = vpop.f32.mrf.mxu1  ;;  %3716 = vmatmul.mubr.msk.bf16.vlgmr.msra.gmra.mxu1 %vm1101_vm3, %v1181_v37 }
 0x435   : > { %3728 = vmatpush3.bf16.msra.mxu1 %v1806_v7  ;;  %3731 = vmatprep.mubr.msk.bf16.mxu1 %vm4258_vm6, %v4257_v32  ;;  %v1805_v56 = vpack.c.bf16 %v1563_v63, %v1560_v47 }
 0x436   : > { %v3687_v1 = vpop.f32.mrf.mxu1  ;;  %3729 = vmatprep.subr.bf16.mxu1 %v4257_v32  ;;  %3724 = vmatmul.mubr.msk.bf16.vlgmr.msra.gmra.mxu0 %vm1101_vm3, %v1182_v50 }
 0x437   : > { %3736 = vmatpush3.bf16.msra.mxu0 %v1808_v54  ;;  %3739 = vmatprep.mubr.msk.bf16.mxu0 %vm4258_vm6, %v4257_v32 }
 0x438   : > { %v1708_v20 = vpop.f32.mrf.mxu1  ;;  %3737 = vmatprep.subr.bf16.mxu0 %v4257_v32 }
 0x439   : > { %3730 = vmatpush3.bf16.msra.mxu1 %v1805_v56  ;;  %v2388_v56 = vpop.trf.xlu1 }
 0x43a   : > { %v3688_v8 = vpop.f32.mrf.mxu1  ;;  %3743 = vmatprep.subr.bf16.mxu1 %v4257_v32 }
 0x43b   : > { %v1810_v9 = vpack.c.bf16 %v3688_v8, %v3687_v1  ;;  %3738 = vmatpush3.bf16.msra.mxu0 %v1807_v27  ;;  %v2463_v8 = vpop.trf.xlu0 }
 0x43c   : > { %v1711_v13 = vpop.f32.mrf.mxu1  ;;  %3732 = vmatmul.mubr.msk.bf16.vlgmr.msra.gmra.mxu1 %vm1101_vm3, %v1183_v3  ;;  %3751 = vmatprep.subr.bf16.mxu0 %v4257_v32 }
 0x43d   : > { %3744 = vmatpush3.bf16.msra.mxu1 %v1810_v9  ;;  %3747 = vmatprep.mubr.msk.bf16.mxu1 %vm4258_vm6, %v4257_v32  ;;  %v1809_v15 = vpack.c.bf16 %v1711_v13, %v1708_v20  ;;  %v2389_v14 = vpop.trf.xlu1 }
 0x43e   : > { %3745 = vmatprep.subr.bf16.mxu1 %v4257_v32  ;;  %3740 = vmatmul.mubr.msk.bf16.vlgmr.msra.gmra.mxu0 %vm1101_vm3, %v1184_v23 }
 0x43f   : > { %3752 = vmatpush3.bf16.msra.mxu0 %v1812_v36  ;;  %3755 = vmatprep.mubr.msk.bf16.mxu0 %vm4258_vm6, %v4257_v32  ;;  %v2610_v10 = vpop.trf.xlu0 }
 0x440   : > { %3753 = vmatprep.subr.bf16.mxu0 %v4257_v32 }
 0x441   : > { %3746 = vmatpush3.bf16.msra.mxu1 %v1809_v15  ;;  %v2536_v19 = vpop.trf.xlu1 }
 0x442   : > { %3759 = vmatprep.subr.bf16.mxu1 %v4111_v44 }
 0x443   : > { %3754 = vmatpush3.bf16.msra.mxu0 %v1811_v40  ;;  %v2611_v2 = vpop.trf.xlu0 }
 0x444   : > { %3748 = vmatmul.mubr.msk.bf16.vlgmr.msra.gmra.mxu1 %vm1101_vm3, %v1185_v59 }
 0x445   : > { %3760 = vmatpush3.bf16.msra.mxu1 %v4111_v44  ;;  %3763 = vmatprep.mubr.msk.bf16.mxu1 %vm1101_vm3, %v2176_v57  ;;  %v2537_v54 = vpop.trf.xlu1 }
 0x446   : > { %3761 = vmatprep.subr.bf16.mxu1 %v4112_v62  ;;  %3756 = vmatmul.mubr.msk.bf16.vlgmr.msra.gmra.mxu0 %vm1101_vm3, %v1186_v4 }
 0x447   : > { %3773 = vmatprep.mubr.msk.bf16.mxu0 %vm1219_vm4, %v2314_v35  ;;  %v2758_v27 = vpop.trf.xlu0 }
 0x449   : > { %3762 = vmatpush3.bf16.msra.mxu1 %v4112_v62  ;;  %v2684_v34 = vpop.trf.xlu1 }
 0x44b   : > { %v2759_v36 = vpop.trf.xlu0 }
 0x44c   : > { %3764 = vmatmul.mubr.msk.bf16.vlgmr.msra.gmra.mxu1 %vm1101_vm3, %v2177_v51 }
 0x44d   : > { %3767 = vmatprep.mubr.msk.bf16.mxu1 %vm1101_vm3, %v2178_v0  ;;  %v2685_v40 = vpop.trf.xlu1 }
 0x454   : > { %3768 = vmatmul.mubr.msk.bf16.gmra.mxu1 %vm1101_vm3, %v2179_v6 }
 0x455   : > { %3785 = vmatprep.mubr.msk.bf16.mxu1 %vm1219_vm4, %v2462_v45 }
 0x4e4   : > { %v1850_v46 = vpop.f32.mrf.mxu1 }
 0x4e5   : > { %2158 = vst.msk [vmem:[%s4432_s0] sm:$0xff] %vm1101_vm3, %v1850_v46 }
 0x4e6   : > { %v3701_v29 = vpop.f32.mrf.mxu1 }
 0x4e8   : > { %v1853_v55 = vpop.f32.mrf.mxu1 }
 0x4ea   : > { %v3702_v38 = vpop.f32.mrf.mxu1 }
 0x4ec   : > { %v1893_v4 = vpop.f32.mrf.mxu0 }
 0x4ed   : > { %2159 = vst.msk [vmem:[%s4432_s0 + $0x8] sm:$0xff] %vm1101_vm3, %v1893_v4 }
 0x4ee   : > { %v3709_v35 = vpop.f32.mrf.mxu0 }
 0x4f0   : > { %v1896_v45 = vpop.f32.mrf.mxu0 }
 0x4f2   : > { %v3710_v46 = vpop.f32.mrf.mxu0 }
 0x4f3   : > { %v2286_v46 = vld [vmem:[#allocation2 + $0x34] sm:$0xf] }
 0x4f4   : > { %v1936_v48 = vpop.f32.mrf.mxu1 }
 0x4f5   : > { %2160 = vst.msk [vmem:[%s4432_s0 + $0x10] sm:$0xff] %vm1101_vm3, %v1936_v48 }
 0x4f6   : > { %v3717_v33 = vpop.f32.mrf.mxu1  ;;  %v1979_v55 = vpop.f32.mrf.mxu0 }
 0x4f7   : > { %2161 = vst.msk [vmem:[%s4432_s0 + $0x18] sm:$0xff] %vm1101_vm3, %v1979_v55 }
 0x4f8   : > { %v1939_v11 = vpop.f32.mrf.mxu1  ;;  %v3725_v38 = vpop.f32.mrf.mxu0 }
 0x4fa   : > { %v3718_v26 = vpop.f32.mrf.mxu1  ;;  %v1982_v48 = vpop.f32.mrf.mxu0 }
 0x4fc   : > { %v2022_v52 = vpop.f32.mrf.mxu1  ;;  %v3726_v33 = vpop.f32.mrf.mxu0 }
 0x4fd   : > { %2162 = vst.msk [vmem:[%s4432_s0 + $0x20] sm:$0xff] %vm1101_vm3, %v2022_v52 }
 0x4fe   : > { %v3733_v47 = vpop.f32.mrf.mxu1  ;;  %v2065_v11 = vpop.f32.mrf.mxu0 }
 0x4ff   : > { %2163 = vst.msk [vmem:[%s4432_s0 + $0x28] sm:$0xff] %vm1101_vm3, %v2065_v11  ;;  %v2288_v11 = vld [vmem:[#allocation2 + $0x3c] sm:$0xf] }
 0x500   : > { %v2025_v37 = vpop.f32.mrf.mxu1  ;;  %v3741_v26 = vpop.f32.mrf.mxu0 }
 0x502   : > { %v3734_v12 = vpop.f32.mrf.mxu1  ;;  %v2068_v52 = vpop.f32.mrf.mxu0 }
 0x504   : > { %v2108_v7 = vpop.f32.mrf.mxu1  ;;  %v3742_v47 = vpop.f32.mrf.mxu0 }
 0x505   : > { %2164 = vst.msk [vmem:[%s4432_s0 + $0x30] sm:$0xff] %vm1101_vm3, %v2108_v7 }
 0x506   : > { %v3749_v63 = vpop.f32.mrf.mxu1  ;;  %v2151_v37 = vpop.f32.mrf.mxu0 }
 0x507   : > { %2165 = vst.msk [vmem:[%s4432_s0 + $0x38] sm:$0xff] %vm1101_vm3, %v2151_v37 }
 0x508   : > { %v2111_v1 = vpop.f32.mrf.mxu1  ;;  %v3757_v12 = vpop.f32.mrf.mxu0 }
 0x50a   : > { %v3750_v20 = vpop.f32.mrf.mxu1  ;;  %v2154_v7 = vpop.f32.mrf.mxu0 }
 0x50c   : > { %v3765_v3 = vpop.f32.mrf.mxu1  ;;  %v3758_v63 = vpop.f32.mrf.mxu0 }
 0x50d   : > { %v2258_v9 = vadd.f32 %v3765_v3, %v4796_v5 }
 0x50e   : > { %v2249_v13 = vpop.f32.mrf.mxu1 }
 0x50f   : > { %v2300_v44 = vpack.c.bf16 %v2258_v9, %v2258_v9  ;;  %v2250_v53 = vadd.f32 %v4796_v5, %v2249_v13 }
 0x510   : > { %v3766_v15 = vpop.f32.mrf.mxu1 }
 0x511   : > { %v2477_v59 = vsel %vm1226_vm5, %v2300_v44, 0  ;;  %v2298_v57 = vpack.c.bf16 %v2250_v53, %v2250_v53  ;;  %3893 = vmatprep.subr.msk.bf16.mxu1 %vm1226_vm5, %v2300_v44  ;;  %v2261_v61 = vadd.f32 %v3766_v15, %v4796_v5 }
 0x512   : > { %v2252_v62 = vpop.f32.mrf.mxu1  ;;  %3784 = vmatpush3.bf16.msra.mxu1 %v2477_v59 }
 0x513   : > { %v2329_v30 = vsel %vm1226_vm5, %v2298_v57, 0  ;;  %v2253_v22 = vadd.f32 %v4796_v5, %v2252_v62  ;;  %3891 = vmatprep.subr.msk.bf16.mxu0 %vm1226_vm5, %v2298_v57  ;;  %v2301_v16 = vpack.c.bf16 %v2261_v61, %v2261_v61 }
 0x514   : > { %3772 = vmatpush3.bf16.msra.mxu0 %v2329_v30  ;;  %v3769_v51 = vpop.f32.mrf.mxu1  ;;  %v2281_v30 = vld [vmem:[#allocation2 + $0x20] sm:$0xf] }
 0x515   : > { %v2299_v0 = vpack.c.bf16 %v2253_v22, %v2253_v22  ;;  %v2274_v18 = vadd.f32 %v3769_v51, %v4796_v5  ;;  %3786 = vmatmul.mubr.msk.bf16.vlgmr.msra.gmra.mxu1 %vm1219_vm4, %v2463_v8  ;;  %v2551_v31 = vsel %vm1226_vm5, %v2301_v16, 0 }
 0x516   : > { %v2265_v6 = vpop.f32.mrf.mxu1  ;;  %3797 = vmatprep.mubr.msk.bf16.mxu1 %vm1219_vm4, %v2610_v10 }
 0x517   : > { %v2403_v28 = vsel %vm1226_vm5, %v2299_v0, 0  ;;  %3774 = vmatmul.mubr.msk.bf16.vlgmr.msra.gmra.mxu0 %vm1219_vm4, %v2315_v42  ;;  %3892 = vmatprep.subr.msk.bf16.mxu0 %vm1226_vm5, %v2299_v0  ;;  %v2266_v41 = vadd.f32 %v4796_v5, %v2265_v6  ;;  %v2304_v24 = vpack.c.bf16 %v2274_v18, %v2274_v18 }
 0x518   : > { %3778 = vmatpush3.bf16.msra.mxu0 %v2403_v28  ;;  %v3770_v21 = vpop.f32.mrf.mxu1  ;;  %3779 = vmatprep.mubr.msk.bf16.mxu0 %vm1219_vm4, %v2388_v56 }
 0x519   : > { %3894 = vmatprep.subr.msk.bf16.mxu0 %vm1226_vm5, %v2301_v16  ;;  %v2302_v58 = vpack.c.bf16 %v2266_v41, %v2266_v41  ;;  %v2773_v50 = vsel %vm1226_vm5, %v2304_v24, 0  ;;  %v2277_v17 = vadd.f32 %v3770_v21, %v4796_v5  ;;  %v2282_v21 = vld [vmem:[#allocation2 + $0x24] sm:$0xf] }
 0x51a   : > { %v2268_v43 = vpop.f32.mrf.mxu1 }
 0x51b   : > { %v2625_v25 = vsel %vm1226_vm5, %v2302_v58, 0  ;;  %v2269_v39 = vadd.f32 %v4796_v5, %v2268_v43  ;;  %3895 = vmatprep.subr.msk.bf16.mxu1 %vm1226_vm5, %v2302_v58  ;;  %v2305_v60 = vpack.c.bf16 %v2277_v17, %v2277_v17  ;;  %v2832_v5 = vpop.trf.xlu1 }
 0x51c   : > { %3796 = vmatpush3.bf16.msra.mxu1 %v2625_v25 }
 0x51d   : > { %v2303_v49 = vpack.c.bf16 %v2269_v39, %v2269_v39  ;;  %3897 = vmatprep.subr.msk.bf16.mxu1 %vm1226_vm5, %v2304_v24  ;;  %v2847_v42 = vsel %vm1226_vm5, %v2305_v60, 0  ;;  %v2283_v24 = vld [vmem:[#allocation2 + $0x28] sm:$0xf] }
 0x51f   : > { %3780 = vmatmul.mubr.msk.bf16.vlgmr.msra.gmra.mxu0 %vm1219_vm4, %v2389_v14  ;;  %3798 = vmatmul.mubr.msk.bf16.vlgmr.msra.gmra.mxu1 %vm1219_vm4, %v2611_v2  ;;  %v2699_v23 = vsel %vm1226_vm5, %v2303_v49, 0  ;;  %v2833_v29 = vpop.trf.xlu1 }
 0x520   : > { %3790 = vmatpush3.bf16.msra.mxu0 %v2551_v31  ;;  %3791 = vmatprep.mubr.msk.bf16.mxu0 %vm1219_vm4, %v2536_v19 }
 0x521   : > { %3896 = vmatprep.subr.msk.bf16.mxu0 %vm1226_vm5, %v2303_v49  ;;  %3808 = vmatpush3.bf16.msra.mxu1 %v2773_v50 }
 0x522   : > { %3809 = vmatprep.mubr.msk.bf16.mxu1 %vm1219_vm4, %v2758_v27  ;;  %3819 = vmatprep.subr.bf16.mxu1 %v4257_v32 }
 0x527   : > { %3792 = vmatmul.mubr.msk.bf16.vlgmr.msra.gmra.mxu0 %vm1219_vm4, %v2537_v54  ;;  %3810 = vmatmul.mubr.msk.bf16.vlgmr.msra.gmra.mxu1 %vm1219_vm4, %v2759_v36  ;;  %v2285_v36 = vld [vmem:[#allocation2 + $0x30] sm:$0xf] }
 0x528   : > { %3802 = vmatpush3.bf16.msra.mxu0 %v2699_v23  ;;  %3803 = vmatprep.mubr.msk.bf16.mxu0 %vm1219_vm4, %v2684_v34  ;;  %v2284_v34 = vld [vmem:[#allocation2 + $0x2c] sm:$0xf] }
 0x529   : > { %3898 = vmatprep.subr.msk.bf16.mxu0 %vm1226_vm5, %v2305_v60  ;;  %3823 = vmatprep.mubr.msk.bf16.mxu1 %vm4258_vm6, %v4257_v32 }
 0x52f   : > { %3804 = vmatmul.mubr.msk.bf16.vlgmr.msra.gmra.mxu0 %vm1219_vm4, %v2685_v40 }
 0x530   : > { %3814 = vmatpush3.bf16.msra.mxu0 %v2847_v42  ;;  %3815 = vmatprep.mubr.msk.bf16.mxu0 %vm1219_vm4, %v2832_v5 }
 0x531   : > { %3827 = vmatprep.subr.bf16.mxu0 %v4257_v32 }
 0x537   : > { %3816 = vmatmul.mubr.msk.bf16.vlgmr.msra.gmra.mxu0 %vm1219_vm4, %v2833_v29  ;;  %v2287_v29 = vld [vmem:[#allocation2 + $0x38] sm:$0xf] }
 0x538   : > { %3831 = vmatprep.mubr.msk.bf16.mxu0 %vm4258_vm6, %v4257_v32 }
 0x5d5   : > { %v3787_v1 = vpop.f32.mrf.mxu1 }
 0x5d7   : > { %v3775_v56 = vpop.f32.mrf.mxu0  ;;  %v2513_v20 = vpop.f32.mrf.mxu1 }
 0x5d9   : > { %v2365_v3 = vpop.f32.mrf.mxu0  ;;  %v3788_v8 = vpop.f32.mrf.mxu1 }
 0x5da   : > { %v2903_v10 = vpack.c.bf16 %v3788_v8, %v3787_v1 }
 0x5db   : > { %v3776_v9 = vpop.f32.mrf.mxu0  ;;  %v2516_v13 = vpop.f32.mrf.mxu1 }
 0x5dc   : > { %v2899_v44 = vpack.c.bf16 %v3776_v9, %v3775_v56  ;;  %v2902_v19 = vpack.c.bf16 %v2516_v13, %v2513_v20 }
 0x5dd   : > { %v2368_v53 = vpop.f32.mrf.mxu0 }
 0x5de   : > { %3820 = vmatpush3.bf16.msra.mxu1 %v2899_v44  ;;  %v2898_v59 = vpack.c.bf16 %v2368_v53, %v2365_v3 }
 0x5df   : > { %v3781_v14 = vpop.f32.mrf.mxu0  ;;  %3821 = vmatprep.subr.bf16.mxu1 %v4257_v32  ;;  %v3799_v15 = vpop.f32.mrf.mxu1 }
 0x5e1   : > { %v2439_v57 = vpop.f32.mrf.mxu0  ;;  %v2661_v62 = vpop.f32.mrf.mxu1 }
 0x5e2   : > { %3822 = vmatpush3.bf16.msra.mxu1 %v2898_v59 }
 0x5e3   : > { %v3782_v61 = vpop.f32.mrf.mxu0  ;;  %3835 = vmatprep.subr.bf16.mxu1 %v4257_v32  ;;  %v3800_v22 = vpop.f32.mrf.mxu1 }
 0x5e4   : > { %v2901_v51 = vpack.c.bf16 %v3782_v61, %v3781_v14  ;;  %v2907_v2 = vpack.c.bf16 %v3800_v22, %v3799_v15 }
 0x5e5   : > { %v2442_v0 = vpop.f32.mrf.mxu0  ;;  %3824 = vmatmul.mubr.msk.bf16.vlgmr.msra.gmra.mxu1 %vm1101_vm3, %v2281_v30  ;;  %v2664_v18 = vpop.f32.mrf.mxu1 }
 0x5e6   : > { %3828 = vmatpush3.bf16.msra.mxu0 %v2901_v51  ;;  %3836 = vmatpush3.bf16.msra.mxu1 %v2903_v10  ;;  %v2900_v28 = vpack.c.bf16 %v2442_v0, %v2439_v57  ;;  %v2906_v54 = vpack.c.bf16 %v2664_v18, %v2661_v62 }
 0x5e7   : > { %v3793_v6 = vpop.f32.mrf.mxu0  ;;  %3829 = vmatprep.subr.bf16.mxu0 %v4257_v32  ;;  %3837 = vmatprep.subr.bf16.mxu1 %v4257_v32  ;;  %v3811_v16 = vpop.f32.mrf.mxu1 }
 0x5e8   : > { %3839 = vmatprep.mubr.msk.bf16.mxu1 %vm4258_vm6, %v4257_v32 }
 0x5e9   : > { %v2587_v41 = vpop.f32.mrf.mxu0  ;;  %v2809_v43 = vpop.f32.mrf.mxu1 }
 0x5ea   : > { %3830 = vmatpush3.bf16.msra.mxu0 %v2900_v28  ;;  %3838 = vmatpush3.bf16.msra.mxu1 %v2902_v19 }
 0x5eb   : > { %v3794_v58 = vpop.f32.mrf.mxu0  ;;  %3843 = vmatprep.subr.bf16.mxu0 %v4257_v32  ;;  %3851 = vmatprep.subr.bf16.mxu1 %v4257_v32  ;;  %v3812_v50 = vpop.f32.mrf.mxu1 }
 0x5ec   : > { %v2905_v25 = vpack.c.bf16 %v3794_v58, %v3793_v6  ;;  %v2911_v17 = vpack.c.bf16 %v3812_v50, %v3811_v16 }
 0x5ed   : > { %v2590_v39 = vpop.f32.mrf.mxu0  ;;  %3832 = vmatmul.mubr.msk.bf16.vlgmr.msra.gmra.mxu0 %vm1101_vm3, %v2282_v21  ;;  %3840 = vmatmul.mubr.msk.bf16.vlgmr.msra.gmra.mxu1 %vm1101_vm3, %v2283_v24  ;;  %v2812_v60 = vpop.f32.mrf.mxu1 }
 0x5ee   : > { %3844 = vmatpush3.bf16.msra.mxu0 %v2905_v25  ;;  %3852 = vmatpush3.bf16.msra.mxu1 %v2907_v2  ;;  %v2904_v27 = vpack.c.bf16 %v2590_v39, %v2587_v41  ;;  %v2910_v5 = vpack.c.bf16 %v2812_v60, %v2809_v43 }
 0x5ef   : > { %v3805_v49 = vpop.f32.mrf.mxu0  ;;  %3845 = vmatprep.subr.bf16.mxu0 %v4257_v32  ;;  %3847 = vmatprep.mubr.msk.bf16.mxu0 %vm4258_vm6, %v4257_v32 }
 0x5f0   : > { %3853 = vmatprep.subr.bf16.mxu1 %v4257_v32  ;;  %3855 = vmatprep.mubr.msk.bf16.mxu1 %vm4258_vm6, %v4257_v32 }
 0x5f1   : > { %v2735_v31 = vpop.f32.mrf.mxu0 }
 0x5f2   : > { %3846 = vmatpush3.bf16.msra.mxu0 %v2904_v27  ;;  %3854 = vmatpush3.bf16.msra.mxu1 %v2906_v54 }
 0x5f3   : > { %v3806_v23 = vpop.f32.mrf.mxu0  ;;  %3859 = vmatprep.subr.bf16.mxu0 %v4257_v32  ;;  %3867 = vmatprep.subr.bf16.mxu1 %v4257_v32 }
 0x5f4   : > { %v2909_v40 = vpack.c.bf16 %v3806_v23, %v3805_v49 }
 0x5f5   : > { %v2738_v4 = vpop.f32.mrf.mxu0  ;;  %3848 = vmatmul.mubr.msk.bf16.vlgmr.msra.gmra.mxu0 %vm1101_vm3, %v2284_v34  ;;  %3856 = vmatmul.mubr.msk.bf16.vlgmr.msra.gmra.mxu1 %vm1101_vm3, %v2285_v36 }
 0x5f6   : > { %3860 = vmatpush3.bf16.msra.mxu0 %v2909_v40  ;;  %3868 = vmatpush3.bf16.msra.mxu1 %v2911_v17  ;;  %v2908_v42 = vpack.c.bf16 %v2738_v4, %v2735_v31 }
 0x5f7   : > { %v3817_v35 = vpop.f32.mrf.mxu0  ;;  %3861 = vmatprep.subr.bf16.mxu0 %v4257_v32  ;;  %3863 = vmatprep.mubr.msk.bf16.mxu0 %vm4258_vm6, %v4257_v32 }
 0x5f8   : > { %3869 = vmatprep.subr.bf16.mxu1 %v4257_v32  ;;  %3871 = vmatprep.mubr.msk.bf16.mxu1 %vm4258_vm6, %v4257_v32 }
 0x5f9   : > { %v2883_v45 = vpop.f32.mrf.mxu0 }
 0x5fa   : > { %3862 = vmatpush3.bf16.msra.mxu0 %v2908_v42  ;;  %3870 = vmatpush3.bf16.msra.mxu1 %v2910_v5 }
 0x5fb   : > { %v3818_v55 = vpop.f32.mrf.mxu0  ;;  %3875 = vmatprep.subr.bf16.mxu0 %v4257_v32 }
 0x5fc   : > { %v2913_v38 = vpack.c.bf16 %v3818_v55, %v3817_v35 }
 0x5fd   : > { %v2886_v48 = vpop.f32.mrf.mxu0  ;;  %3864 = vmatmul.mubr.msk.bf16.vlgmr.msra.gmra.mxu0 %vm1101_vm3, %v2286_v46  ;;  %3872 = vmatmul.mubr.msk.bf16.vlgmr.msra.gmra.mxu1 %vm1101_vm3, %v2287_v29 }
 0x5fe   : > { %3876 = vmatpush3.bf16.msra.mxu0 %v2913_v38  ;;  %3879 = vmatprep.mubr.msk.bf16.mxu0 %vm4258_vm6, %v4257_v32  ;;  %v2912_v33 = vpack.c.bf16 %v2886_v48, %v2883_v45 }
 0x5ff   : > { %3877 = vmatprep.subr.bf16.mxu0 %v4257_v32 }
 0x602   : > { %3878 = vmatpush3.bf16.msra.mxu0 %v2912_v33 }
 0x605   : > { %3880 = vmatmul.mubr.msk.bf16.vlgmr.msra.gmra.mxu0 %vm1101_vm3, %v2288_v11 }
 0x6a5   : > { %v2951_v26 = vpop.f32.mrf.mxu1 }
 0x6a6   : > { %3482 = vst.msk [vmem:[%s4432_s0 + $0x40] sm:$0xff] %vm1101_vm3, %v2951_v26 }
 0x6a7   : > { %v3825_v52 = vpop.f32.mrf.mxu1 }
 0x6a9   : > { %v2954_v47 = vpop.f32.mrf.mxu1 }
 0x6ab   : > { %v3826_v37 = vpop.f32.mrf.mxu1 }
 0x6ad   : > { %v2994_v12 = vpop.f32.mrf.mxu0  ;;  %v3037_v7 = vpop.f32.mrf.mxu1 }
 0x6ae   : > { %3483 = vst.msk [vmem:[%s4432_s0 + $0x48] sm:$0xff] %vm1101_vm3, %v2994_v12  ;;  %3484 = vst.msk [vmem:[%s4432_s0 + $0x50] sm:$0xff] %vm1101_vm3, %v3037_v7 }
 0x6af   : > { %v3833_v32 = vpop.f32.mrf.mxu0  ;;  %v3841_v63 = vpop.f32.mrf.mxu1 }
 0x6b1   : > { %v2997_v1 = vpop.f32.mrf.mxu0  ;;  %v3040_v56 = vpop.f32.mrf.mxu1 }
 0x6b3   : > { %v3834_v20 = vpop.f32.mrf.mxu0  ;;  %v3842_v3 = vpop.f32.mrf.mxu1 }
 0x6b5   : > { %v3080_v8 = vpop.f32.mrf.mxu0  ;;  %v3123_v9 = vpop.f32.mrf.mxu1 }
 0x6b6   : > { %3485 = vst.msk [vmem:[%s4432_s0 + $0x58] sm:$0xff] %vm1101_vm3, %v3080_v8  ;;  %3486 = vst.msk [vmem:[%s4432_s0 + $0x60] sm:$0xff] %vm1101_vm3, %v3123_v9 }
 0x6b7   : > { %v3849_v13 = vpop.f32.mrf.mxu0  ;;  %v3857_v44 = vpop.f32.mrf.mxu1 }
 0x6b9   : > { %v3083_v53 = vpop.f32.mrf.mxu0  ;;  %v3126_v14 = vpop.f32.mrf.mxu1 }
 0x6bb   : > { %v3850_v15 = vpop.f32.mrf.mxu0  ;;  %v3858_v59 = vpop.f32.mrf.mxu1 }
 0x6bd   : > { %v3166_v57 = vpop.f32.mrf.mxu0  ;;  %v3209_v62 = vpop.f32.mrf.mxu1 }
 0x6be   : > { %3487 = vst.msk [vmem:[%s4432_s0 + $0x68] sm:$0xff] %vm1101_vm3, %v3166_v57  ;;  %3488 = vst.msk [vmem:[%s4432_s0 + $0x70] sm:$0xff] %vm1101_vm3, %v3209_v62 }
 0x6bf   : > { %v3865_v10 = vpop.f32.mrf.mxu0  ;;  %v3873_v30 = vpop.f32.mrf.mxu1 }
 0x6c1   : > { %v3169_v61 = vpop.f32.mrf.mxu0  ;;  %v3212_v22 = vpop.f32.mrf.mxu1 }
 0x6c3   : > { %v3866_v51 = vpop.f32.mrf.mxu0  ;;  %v3874_v0 = vpop.f32.mrf.mxu1 }
 0x6c5   : > { %v3252_v18 = vpop.f32.mrf.mxu0 }
 0x6c6   : > { %3489 = vst.msk [vmem:[%s4432_s0 + $0x78] sm:$0xff] %vm1101_vm3, %v3252_v18 }
 0x6c7   : > { %v3881_v19 = vpop.f32.mrf.mxu0 }
 0x6c8   : > { %4180 = shalt.err (!%p4177_p7)
}
 0x6c9   : > { %s4181_s0 = scalar_lea.hbm %s5013_s18, 2048  ;;  %s4185_s10 = scalar_lea.hbm %s5071_s6, 4096 }
 0x6ca   : > { %p4182_p4 = scmp.ne.s32.totalorder %s5013_s18, %s4181_s0  ;;  %p4186_p11 = scmp.lt.s32.totalorder %s5013_s18, %s5071_s6 }
 0x6cb   : > { %p4187_p10 = scmp.lt.s32.totalorder %s4185_s10, %s4181_s0 }
 0x6cc   : > { %p4183_p6 = pnand %p4182_p4, %p4387_p13 }
 0x6cd   : > { %p4188_p8 = por %p4187_p10, %p4186_p11 }
 0x6ce   : > { %p4184_p9 = pneg %p4183_p6 }
 0x6d0   : > { %p4189_p1 = pnand %p4188_p8, %p4184_p9 }
 0x6d2   : > { %4192 = shalt.err (!%p4189_p1)
}
 0x6d3   : > { %s4260_s9 = smov 128   ;;  %s4261_s17 = smov 8   ;;  %v3255_v6 = vpop.f32.mrf.mxu0 }
 0x6d4   : > { %3905 = dma.vmem_to_hbm [thread:$0]  (%p4387_p13), %s5015_s13, 2048, %s5013_s18, %s3268_s24, %s4260_s9, %s4260_s9, %s4261_s17  }
 0x6d5   : > { %v3882_v16 = vpop.f32.mrf.mxu0 }
 0x6d6 PF: > { %s3298_s15 = sand.u32 1, %s4231_s21   ;;  %p5093_p12 = scmp.ne.s32.totalorder %s5082_s8, 0 }
 0x6d7   : > { %p5094_p0 = scmp.ge.s32.totalorder %s4251_s26, 2  ;;  %s3299_s7 = scalar_lea.sflag [#allocation6], %s3298_s15 }
 0x6d9   : > { %p3916_p2 = pnand %p5094_p0, %p5093_p12 }
 0x6db   : > { %p3917_p3 = pneg %p3916_p2 }
 0x6dd   : > { %4226 = dma.done.wait (%p3917_p3), %s3299_s7, 2048  }
 0x6de   : > { %4228 = vsyncadd (%p3917_p3), %s3299_s7, 4294965248  ;;  %s23_s26 = sadd.s32 1, %s4251_s26   ;;  %s5095_s24 = sld [smem:[#allocation13_spill]] }
 0x6df   : > { %p20_p5 = scmp.ge.s32.totalorder %s23_s26, 4   ;;  %s5096_s25 = sld [smem:[#allocation14_spill]] }
 0x6e0   : > { %s5097_s21 = smov %s4235_s22  ;;  %s5098_s22 = smov %s4239_s23 }
 0x6e1   : > { %s5099_s23 = smov %s4396_s12  ;;  %22 = sbr.rel (!%p20_p5) target bundleno = 9 (0x9), region = 109 }
 0x6e6   :  { %3304 = vsyncpa [#allocation5], 1 }
 0x6e7   :  { %3306 = vsyncpa [#allocation5 + $0x1], 1 }
 0x6e8   :  { %3307 = vsyncpa [#allocation8], 1 }
 0x6e9   :  { %3309 = vsyncpa [#allocation8 + $0x1], 1 }
 0x6ea   :  { %3310 = vsyncpa [#allocation6], 1 }
 0x6eb   :  { %3312 = vsyncpa [#allocation6 + $0x1], 1 }

</bundles_post_ra>
